<compile_context>
chip_gen: v5e
topology: v5e:2x2
jax: 0.10.0
libtpu: 0.0.40
codegen_flags: <defaults>
</compile_context>

<pallas_src>
import math

import jax
import jax.numpy as jnp
from jax.experimental import pallas as pl
from jax.experimental.pallas import tpu as pltpu


# ---------------------------------------------------------------------------
# Fused Pallas kernel: two nn.Linear heads in one launch.
#   oc = xc @ Wc^T + bc   (codex projection)
#   ot = xt @ Wt^T + bt   (text  projection)
# Weights arrive already transposed ([Din, Dout], bf16); biases are f32.
# ---------------------------------------------------------------------------
def _fused_proj_kernel(xc_ref, wc_ref, bc_ref, xt_ref, wt_ref, bt_ref,
                       oc_ref, ot_ref):
    # Codex head: [tb, Dc] @ [Dc, tn] -> [tb, tn]
    xc = xc_ref[...].astype(jnp.bfloat16)
    acc_c = jnp.dot(xc, wc_ref[...], preferred_element_type=jnp.float32)
    oc_ref[...] = (acc_c + bc_ref[...]).astype(oc_ref.dtype)

    # Text head: [tb, Dt] @ [Dt, tn] -> [tb, tn]
    xt = xt_ref[...].astype(jnp.bfloat16)
    acc_t = jnp.dot(xt, wt_ref[...], preferred_element_type=jnp.float32)
    ot_ref[...] = (acc_t + bt_ref[...]).astype(ot_ref.dtype)


def fused_projections(xc, wc_t, bc, xt, wt_t, bt,
                      *, col_blocks=1, row_block=512,
                      single_block_max_rows=512):
    """Both projection heads in a single pallas_call.

    xc: [B, Dc] f32, wc_t: [Dc, P] bf16, bc: [P] f32
    xt: [B, Dt] f32, wt_t: [Dt, P] bf16, bt: [P] f32
    col_blocks: split the projection dim into this many "parallel" blocks
                (set to 2 on v7x to use both TensorCores; 1 elsewhere).
    returns (codex_proj [B, P] f32, text_proj [B, P] f32)
    """
    B, Dc = xc.shape
    Dt = xt.shape[1]
    P = wc_t.shape[1]
    assert wc_t.shape == (Dc, P) and wt_t.shape == (Dt, P)
    assert xt.shape[0] == B
    assert P % col_blocks == 0
    tn = P // col_blocks
    assert col_blocks == 1 or tn % 128 == 0

    if B <= single_block_max_rows:
        # Small / launch-bound regime: one batch block == full batch, no padding,
        # no output slicing.  Block shape equals the array extent on the batch
        # axis, so the (8,128) divisibility rule does not apply.
        tb = B
        B_pad = B
        xc_p, xt_p = xc, xt
    else:
        # Large-batch regime: tile the batch so activations/outputs pipeline and
        # VMEM stays bounded (v5e 16 MiB / v7x 32 MiB scoped defaults).  The pad
        # cost is amortized over many grid steps here.
        tb = row_block
        B_pad = ((B + tb - 1) // tb) * tb
        xc_p = jnp.pad(xc, ((0, B_pad - B), (0, 0))) if B_pad != B else xc
        xt_p = jnp.pad(xt, ((0, B_pad - B), (0, 0))) if B_pad != B else xt
    nb = B_pad // tb

    bc2 = bc.reshape(1, P)
    bt2 = bt.reshape(1, P)

    flops = 2 * B_pad * (Dc + Dt) * P
    bytes_accessed = (
        xc_p.size * 4 + xt_p.size * 4        # activations (f32)
        + wc_t.size * 2 + wt_t.size * 2      # weights (bf16)
        + bc2.size * 4 + bt2.size * 4        # biases (f32)
        + 2 * B_pad * P * 4                  # outputs (f32)
    )

    # Grid: (column blocks [outer], batch blocks [inner]).  Weight/bias blocks
    # are indexed only by the outer column axis, so they stay VMEM-resident
    # across all inner batch steps (no repeated weight DMA at large B).
    out_c, out_t = pl.pallas_call(
        _fused_proj_kernel,
        out_shape=(
            jax.ShapeDtypeStruct((B_pad, P), jnp.float32),
            jax.ShapeDtypeStruct((B_pad, P), jnp.float32),
        ),
        grid_spec=pltpu.PrefetchScalarGridSpec(
            num_scalar_prefetch=0,
            grid=(col_blocks, nb),
            in_specs=[
                pl.BlockSpec((tb, Dc), lambda j, i: (i, 0)),  # xc
                pl.BlockSpec((Dc, tn), lambda j, i: (0, j)),  # Wc^T (bf16)
                pl.BlockSpec((1, tn), lambda j, i: (0, j)),   # bc
                pl.BlockSpec((tb, Dt), lambda j, i: (i, 0)),  # xt
                pl.BlockSpec((Dt, tn), lambda j, i: (0, j)),  # Wt^T (bf16)
                pl.BlockSpec((1, tn), lambda j, i: (0, j)),   # bt
            ],
            out_specs=[
                pl.BlockSpec((tb, tn), lambda j, i: (i, j)),
                pl.BlockSpec((tb, tn), lambda j, i: (i, j)),
            ],
        ),
        compiler_params=pltpu.CompilerParams(
            dimension_semantics=("parallel", "parallel"),
        ),
        cost_estimate=pl.CostEstimate(
            flops=flops, transcendentals=0, bytes_accessed=bytes_accessed
        ),
    )(xc_p, wc_t, bc2, xt_p, wt_t, bt2)

    if B_pad != B:
        out_c = out_c[:B]
        out_t = out_t[:B]
    return out_c, out_t


# ---------------------------------------------------------------------------
# Parameter init, matching BaseCodexCLIP._initialize_weights:
#   Xavier-uniform weights, zero bias. Weights are stored PRE-TRANSPOSED
#   ([Din, Dout]) and in bf16 so no per-call transpose/cast is needed.
#   (Xavier bound depends only on fan_in + fan_out, so generating directly in
#   transposed layout is distributionally identical.)
# ---------------------------------------------------------------------------
def xavier_uniform_t(key, in_dim, out_dim):
    bound = math.sqrt(6.0 / (in_dim + out_dim))
    w = jax.random.uniform(key, (in_dim, out_dim), jnp.float32,
                           minval=-bound, maxval=bound)
    return w.astype(jnp.bfloat16)


def init_params(key, codex_dim=384, text_dim=768, projection_dim=512):
    k1, k2 = jax.random.split(key)
    return {
        "codex_projection": {
            "weight_t": xavier_uniform_t(k1, codex_dim, projection_dim),  # [Dc, P] bf16
            "bias": jnp.zeros((projection_dim,), jnp.float32),
        },
        "text_projection": {
            "weight_t": xavier_uniform_t(k2, text_dim, projection_dim),   # [Dt, P] bf16
            "bias": jnp.zeros((projection_dim,), jnp.float32),
        },
    }


# ---------------------------------------------------------------------------
# BaseCodexCLIP forward (projection heads; shared_projection=False path)
# ---------------------------------------------------------------------------
def base_codex_clip_forward(params, codex_features, text_cls, *, col_blocks=1):
    image_features, text_features = fused_projections(
        codex_features,
        params["codex_projection"]["weight_t"],
        params["codex_projection"]["bias"],
        text_cls,
        params["text_projection"]["weight_t"],
        params["text_projection"]["bias"],
        col_blocks=col_blocks,
    )
    return {"codex": image_features, "text": text_features}


if __name__ == "__main__":
    B = 2
    CODEX_DIM = 384
    TEXT_DIM = 768
    PROJ_DIM = 512

    key = jax.random.PRNGKey(0)
    k_params, k_codex, k_text = jax.random.split(key, 3)

    params = init_params(k_params, CODEX_DIM, TEXT_DIM, PROJ_DIM)

    # Stand-ins for encoder outputs (encoders themselves are external deps).
    codex_features = jax.random.normal(k_codex, (B, CODEX_DIM), jnp.float32)
    text_cls = jax.random.normal(k_text, (B, TEXT_DIM), jnp.float32)

    out = base_codex_clip_forward(params, codex_features, text_cls)
    out = jax.tree_util.tree_map(jax.block_until_ready, out)

    # Sanity check against a plain-JAX reference using the same bf16 operands.
    wc_f32 = params["codex_projection"]["weight_t"].astype(jnp.float32)
    wt_f32 = params["text_projection"]["weight_t"].astype(jnp.float32)
    xc_bf = codex_features.astype(jnp.bfloat16).astype(jnp.float32)
    xt_bf = text_cls.astype(jnp.bfloat16).astype(jnp.float32)
    ref_codex = xc_bf @ wc_f32 + params["codex_projection"]["bias"]
    ref_text = xt_bf @ wt_f32 + params["text_projection"]["bias"]

    assert out["codex"].shape == (B, PROJ_DIM)
    assert out["text"].shape == (B, PROJ_DIM)
    assert jnp.allclose(out["codex"], ref_codex, atol=1e-2, rtol=1e-2)
    assert jnp.allclose(out["text"], ref_text, atol=1e-2, rtol=1e-2)

    print("KERNEL_OK")
</pallas_src>

<mosaic_0001>
module attributes {stable_mosaic.version = 11 : i64} {
  func.func @_fused_proj_kernel(%arg0: i32, %arg1: i32, %arg2: memref<2x384xf32, #tpu.memory_space<vmem>>, %arg3: memref<384x512xbf16, #tpu.memory_space<vmem>>, %arg4: memref<1x512xf32, #tpu.memory_space<vmem>>, %arg5: memref<2x768xf32, #tpu.memory_space<vmem>>, %arg6: memref<768x512xbf16, #tpu.memory_space<vmem>>, %arg7: memref<1x512xf32, #tpu.memory_space<vmem>>, %arg8: memref<2x512xf32, #tpu.memory_space<vmem>>, %arg9: memref<2x512xf32, #tpu.memory_space<vmem>>) attributes {dimension_semantics = [#tpu.dimension_semantics<parallel>, #tpu.dimension_semantics<parallel>], iteration_bounds = array<i64: 1, 1>, scalar_prefetch = 0 : i64, scratch_operands = 0 : i64, tpu.core_type = #tpu.core_type<tc>, window_params = [{transform_indices = @transform_0, window_bounds = array<i64: 2, 384>}, {transform_indices = @transform_1, window_bounds = array<i64: 384, 512>}, {transform_indices = @transform_2, window_bounds = array<i64: 1, 512>}, {transform_indices = @transform_3, window_bounds = array<i64: 2, 768>}, {transform_indices = @transform_4, window_bounds = array<i64: 768, 512>}, {transform_indices = @transform_5, window_bounds = array<i64: 1, 512>}, {transform_indices = @transform_6, window_bounds = array<i64: 2, 512>}, {transform_indices = @transform_7, window_bounds = array<i64: 2, 512>}]} {
    %c0 = arith.constant 0 : index
    %c0_0 = arith.constant 0 : index
    %0 = vector.load %arg2[%c0, %c0_0] : memref<2x384xf32, #tpu.memory_space<vmem>>, vector<2x384xf32>
    %1 = arith.truncf %0 : vector<2x384xf32> to vector<2x384xbf16>
    %c0_1 = arith.constant 0 : index
    %c0_2 = arith.constant 0 : index
    %2 = vector.load %arg3[%c0_1, %c0_2] : memref<384x512xbf16, #tpu.memory_space<vmem>>, vector<384x512xbf16>
    %cst = arith.constant dense<0.000000e+00> : vector<2x512xf32>
    %3 = tpu.matmul %1, %2, %cst {dimension_numbers = #tpu.dot_dimension_numbers<[1], [0], [0], [1], [0, 0, 1, 1], [], []>} : vector<2x384xbf16>, vector<384x512xbf16>, vector<2x512xf32> -> vector<2x512xf32>
    %c0_3 = arith.constant 0 : index
    %c0_4 = arith.constant 0 : index
    %4 = vector.load %arg4[%c0_3, %c0_4] : memref<1x512xf32, #tpu.memory_space<vmem>>, vector<1x512xf32>
    %5 = vector.broadcast %4 : vector<1x512xf32> to vector<2x512xf32>
    %6 = arith.addf %3, %5 : vector<2x512xf32>
    %c0_5 = arith.constant 0 : index
    %c0_6 = arith.constant 0 : index
    %7 = vector.load %arg8[%c0_5, %c0_6] : memref<2x512xf32, #tpu.memory_space<vmem>>, vector<2x512xf32>
    tpu.vector_store %arg8[%c0_5, %c0_6], %6 {strides = array<i32>} : memref<2x512xf32, #tpu.memory_space<vmem>>, vector<2x512xf32>,
    %c0_7 = arith.constant 0 : index
    %c0_8 = arith.constant 0 : index
    %8 = vector.load %arg5[%c0_7, %c0_8] : memref<2x768xf32, #tpu.memory_space<vmem>>, vector<2x768xf32>
    %9 = arith.truncf %8 : vector<2x768xf32> to vector<2x768xbf16>
    %c0_9 = arith.constant 0 : index
    %c0_10 = arith.constant 0 : index
    %10 = vector.load %arg6[%c0_9, %c0_10] : memref<768x512xbf16, #tpu.memory_space<vmem>>, vector<768x512xbf16>
    %cst_11 = arith.constant dense<0.000000e+00> : vector<2x512xf32>
    %11 = tpu.matmul %9, %10, %cst_11 {dimension_numbers = #tpu.dot_dimension_numbers<[1], [0], [0], [1], [0, 0, 1, 1], [], []>} : vector<2x768xbf16>, vector<768x512xbf16>, vector<2x512xf32> -> vector<2x512xf32>
    %c0_12 = arith.constant 0 : index
    %c0_13 = arith.constant 0 : index
    %12 = vector.load %arg7[%c0_12, %c0_13] : memref<1x512xf32, #tpu.memory_space<vmem>>, vector<1x512xf32>
    %13 = vector.broadcast %12 : vector<1x512xf32> to vector<2x512xf32>
    %14 = arith.addf %11, %13 : vector<2x512xf32>
    %c0_14 = arith.constant 0 : index
    %c0_15 = arith.constant 0 : index
    %15 = vector.load %arg9[%c0_14, %c0_15] : memref<2x512xf32, #tpu.memory_space<vmem>>, vector<2x512xf32>
    tpu.vector_store %arg9[%c0_14, %c0_15], %14 {strides = array<i32>} : memref<2x512xf32, #tpu.memory_space<vmem>>, vector<2x512xf32>,
    return
  }
  func.func @transform_0(%arg0: i32, %arg1: i32) -> (i32, i32) {
    %c0_i32 = arith.constant 0 : i32
    %c0_i32_0 = arith.constant 0 : i32
    return %arg1, %c0_i32 : i32, i32
  }
  func.func @transform_1(%arg0: i32, %arg1: i32) -> (i32, i32) {
    %c0_i32 = arith.constant 0 : i32
    %c0_i32_0 = arith.constant 0 : i32
    return %c0_i32, %arg0 : i32, i32
  }
  func.func @transform_2(%arg0: i32, %arg1: i32) -> (i32, i32) {
    %c0_i32 = arith.constant 0 : i32
    %c0_i32_0 = arith.constant 0 : i32
    return %c0_i32, %arg0 : i32, i32
  }
  func.func @transform_3(%arg0: i32, %arg1: i32) -> (i32, i32) {
    %c0_i32 = arith.constant 0 : i32
    %c0_i32_0 = arith.constant 0 : i32
    return %arg1, %c0_i32 : i32, i32
  }
  func.func @transform_4(%arg0: i32, %arg1: i32) -> (i32, i32) {
    %c0_i32 = arith.constant 0 : i32
    %c0_i32_0 = arith.constant 0 : i32
    return %c0_i32, %arg0 : i32, i32
  }
  func.func @transform_5(%arg0: i32, %arg1: i32) -> (i32, i32) {
    %c0_i32 = arith.constant 0 : i32
    %c0_i32_0 = arith.constant 0 : i32
    return %c0_i32, %arg0 : i32, i32
  }
  func.func @transform_6(%arg0: i32, %arg1: i32) -> (i32, i32) {
    %c0_i32 = arith.constant 0 : i32
    return %arg1, %arg0 : i32, i32
  }
  func.func @transform_7(%arg0: i32, %arg1: i32) -> (i32, i32) {
    %c0_i32 = arith.constant 0 : i32
    return %arg1, %arg0 : i32, i32
  }
}

</mosaic_0001>

<bundles_post_ra>
// kernel: tpu_custom_call.1
= control target key start
LH: loop header
LB: loop body
LE: loop exit
PB: predicated region body
PF: predicated region fallthrough
CT: control target
= control target key end

     0   :  { %13 = vsyncpa [#allocation3], 0  ;;  %s4210_s0 = inlined_call_operand.hbm [shape: f32[2,384], index: 0, kind: input, shape index: {}]   ;;  %s4211_s1 = inlined_call_operand.hbm [shape: bf16[384,512], index: 1, kind: input, shape index: {}]   ;;  %s4212_s2 = inlined_call_operand.hbm [shape: f32[1,512], index: 2, kind: input, shape index: {}]   ;;  %s4213_s3 = inlined_call_operand.hbm [shape: f32[2,768], index: 3, kind: input, shape index: {}]   ;;  %s4214_s4 = inlined_call_operand.hbm [shape: bf16[768,512], index: 4, kind: input, shape index: {}]   ;;  %s4215_s5 = inlined_call_operand.vmem [shape: f32[1,512], index: 5, kind: input, shape index: {}]   ;;  %s4216_s6 = inlined_call_operand.hbm [shape: f32[2,512], index: 6, kind: output, shape index: {0}]   ;;  %s4217_s7 = inlined_call_operand.hbm [shape: f32[2,512], index: 7, kind: output, shape index: {1}]  }
   0x1   :  { %14 = vsyncpa [#allocation6], 0 }
   0x2   :  { %15 = vsyncpa [#allocation9], 0 }
   0x3   :  { %16 = vsyncpa [#allocation4], 0  ;;  %s33_s26 = sshll.u32 %s4211_s1, 4  ;;  %s34_s26 = int_to_ptr.hbm [resolvable:$true] %s33_s26 }
   0x4   :  { %17 = vsyncpa [#allocation13], 0  ;;  %s4041_s27 = smov [#allocation5]   ;;  %s58_s8 = sshll.u32 %s4213_s3, 4  ;;  %s59_s8 = int_to_ptr.hbm [resolvable:$true] %s58_s8 }
   0x5   :  { %s35_s28 = sshll.u32 %s4041_s27, 4  ;;  %s4042_s9 = smov 256   ;;  %s36_s28 = int_to_ptr.vmem [resolvable:$true] %s35_s28 }
   0x6   :  { %s4043_s10 = smov 16   ;;  %s4044_s11 = smov [#allocation8]  }
   0x7   :  { %41 = dma.hbm_to_vmem [thread:$0]  %s34_s26, 12288, %s36_s28, [#allocation6], %s4042_s9, %s4042_s9, %s4043_s10  }
   0x8   :  { %s60_s12 = sshll.u32 %s4044_s11, 4  ;;  %s23_s15 = sshll.u32 %s4210_s0, 4  ;;  %s61_s12 = int_to_ptr.vmem [resolvable:$true] %s60_s12  ;;  %s24_s15 = int_to_ptr.hbm [resolvable:$true] %s23_s15 }
   0x9   :  { %63 = dma.hbm_to_vmem [thread:$0]  %s59_s8, 192, %s61_s12, [#allocation9]  }
   0xa   :  { %s47_s17 = sshll.u32 %s4212_s2, 4  ;;  %s4045_s18 = smov [#allocation2]   ;;  %s48_s17 = int_to_ptr.hbm [resolvable:$true] %s47_s17 }
   0xb   :  { %s25_s19 = sshll.u32 %s4045_s18, 4  ;;  %s4046_s3 = smov [#allocation7]   ;;  %s26_s19 = int_to_ptr.vmem [resolvable:$true] %s25_s19 }
   0xc   :  { %28 = dma.hbm_to_vmem [thread:$0]  %s24_s15, 96, %s26_s19, [#allocation3]  }
   0xd   :  { %s49_s20 = sshll.u32 %s4046_s3, 4  ;;  %s68_s23 = sshll.u32 %s4214_s4, 4  ;;  %s50_s20 = int_to_ptr.vmem [resolvable:$true] %s49_s20  ;;  %s69_s23 = int_to_ptr.hbm [resolvable:$true] %s68_s23 }
   0xe   :  { %52 = dma.hbm_to_vmem [thread:$0]  %s48_s17, 64, %s50_s20, [#allocation6]  }
   0xf   :  { %s4047_s0 = smov [#allocation10]  }
  0x10   :  { %s70_s24 = sshll.u32 %s4047_s0, 4  ;;  %s71_s24 = int_to_ptr.vmem [resolvable:$true] %s70_s24 }
  0x11   :  { %76 = dma.hbm_to_vmem [thread:$0]  %s69_s23, 24576, %s71_s24, [#allocation9], %s4042_s9, %s4042_s9, %s4043_s10  }
  0x12   :  { %4031 = dma.done.wait [#allocation3], 96  }
  0x13   :  { %4032 = vsyncadd [#allocation3], 4294967200 }
  0x14   :  { %4033 = dma.done.wait [#allocation6], 12352  }
  0x15   :  { %4034 = vsyncadd [#allocation6], 4294954944 }
  0x16   :  { %4035 = dma.done.wait [#allocation9], 24768  }
  0x17   :  { %4036 = vsyncadd [#allocation9], 4294942528  ;;  %v2528_v0 = vld [vmem:[#allocation5 + $0xe0] sm:$0xf]  ;;  %v3596_v1 = vld [vmem:[#allocation5 + $0xec] sm:$0xf0] }
  0x18   :  { %v2656_v2 = vld [vmem:[#allocation5 + $0x1e0] sm:$0xf]  ;;  %v2529_v3 = vor.u32 %v3596_v1, %v2528_v0  ;;  %v3628_v4 = vld [vmem:[#allocation5 + $0x1ec] sm:$0xf0]  ;;  %v3594_v9 = vld [vmem:[#allocation5 + $0xe4] sm:$0xf] }
  0x19   :  { %v2784_v5 = vld [vmem:[#allocation5 + $0x2e0] sm:$0xf]  ;;  %v3660_v6 = vld [vmem:[#allocation5 + $0x2ec] sm:$0xf0]  ;;  %v2657_v7 = vor.u32 %v3628_v4, %v2656_v2  ;;  %v2530_v10 = vld [vmem:[#allocation5 + $0xf0] sm:$0xf0] }
  0x1a   :  { %v2785_v8 = vor.u32 %v3660_v6, %v2784_v5  ;;  %v2512_v11 = vld [vmem:[#allocation5 + $0xc0] sm:$0xf]  ;;  %697 = vmatpush.bf16.msra.mxu0 %v2529_v3  ;;  %v2533_v12 = vor.u32 %v3594_v9, %v2530_v10  ;;  %v3592_v13 = vld [vmem:[#allocation5 + $0xcc] sm:$0xf0]  ;;  %v3590_v20 = vld [vmem:[#allocation5 + $0xc4] sm:$0xf] }
  0x1b   :  { %v2640_v14 = vld [vmem:[#allocation5 + $0x1c0] sm:$0xf]  ;;  %v3624_v15 = vld [vmem:[#allocation5 + $0x1cc] sm:$0xf0]  ;;  %710 = vmatpush.bf16.msra.mxu1 %v2657_v7  ;;  %v2513_v16 = vor.u32 %v3592_v13, %v2512_v11  ;;  %v2514_v22 = vld [vmem:[#allocation5 + $0xd0] sm:$0xf0] }
  0x1c   :  { %723 = vmatpush.bf16.msra.mxu2 %v2785_v8  ;;  %v2641_v17 = vor.u32 %v3624_v15, %v2640_v14  ;;  %v2768_v18 = vld [vmem:[#allocation5 + $0x2c0] sm:$0xf]  ;;  %v3656_v19 = vld [vmem:[#allocation5 + $0x2cc] sm:$0xf0]  ;;  %736 = vmatpush.bf16.msra.mxu3 %v2533_v12  ;;  %v2517_v25 = vor.u32 %v3590_v20, %v2514_v22  ;;  %v3586_v31 = vld [vmem:[#allocation5 + $0xa4] sm:$0xf] }
  0x1d   :  { %v2769_v21 = vor.u32 %v3656_v19, %v2768_v18  ;;  %v2496_v23 = vld [vmem:[#allocation5 + $0xa0] sm:$0xf]  ;;  %v3588_v24 = vld [vmem:[#allocation5 + $0xac] sm:$0xf0]  ;;  %v2498_v32 = vld [vmem:[#allocation5 + $0xb0] sm:$0xf0] }
  0x1e   :  { %v2624_v26 = vld [vmem:[#allocation5 + $0x1a0] sm:$0xf]  ;;  %v3620_v27 = vld [vmem:[#allocation5 + $0x1ac] sm:$0xf0]  ;;  %698 = vmatpush.bf16.msra.mxu0 %v2513_v16  ;;  %v2497_v29 = vor.u32 %v3588_v24, %v2496_v23  ;;  %v2501_v38 = vor.u32 %v3586_v31, %v2498_v32  ;;  %v3582_v42 = vld [vmem:[#allocation5 + $0x84] sm:$0xf] }
  0x1f   :  { %v2752_v28 = vld [vmem:[#allocation5 + $0x2a0] sm:$0xf]  ;;  %v3652_v30 = vld [vmem:[#allocation5 + $0x2ac] sm:$0xf0]  ;;  %711 = vmatpush.bf16.msra.mxu1 %v2641_v17  ;;  %v2625_v33 = vor.u32 %v3620_v27, %v2624_v26  ;;  %v2482_v43 = vld [vmem:[#allocation5 + $0x90] sm:$0xf0] }
  0x20   :  { %724 = vmatpush.bf16.msra.mxu2 %v2769_v21  ;;  %v2753_v34 = vor.u32 %v3652_v30, %v2752_v28  ;;  %v2480_v35 = vld [vmem:[#allocation5 + $0x80] sm:$0xf]  ;;  %v3584_v36 = vld [vmem:[#allocation5 + $0x8c] sm:$0xf0]  ;;  %737 = vmatpush.bf16.msra.mxu3 %v2517_v25  ;;  %v2485_v50 = vor.u32 %v3582_v42, %v2482_v43  ;;  %v3578_v54 = vld [vmem:[#allocation5 + $0x64] sm:$0xf] }
  0x21   :  { %v2608_v37 = vld [vmem:[#allocation5 + $0x180] sm:$0xf]  ;;  %v3616_v39 = vld [vmem:[#allocation5 + $0x18c] sm:$0xf0]  ;;  %v2481_v44 = vor.u32 %v3584_v36, %v2480_v35  ;;  %v2466_v55 = vld [vmem:[#allocation5 + $0x70] sm:$0xf0] }
  0x22   :  { %v2736_v40 = vld [vmem:[#allocation5 + $0x280] sm:$0xf]  ;;  %v3648_v41 = vld [vmem:[#allocation5 + $0x28c] sm:$0xf0]  ;;  %699 = vmatpush.bf16.msra.mxu0 %v2497_v29  ;;  %v2609_v45 = vor.u32 %v3616_v39, %v2608_v37  ;;  %v2469_v62 = vor.u32 %v3578_v54, %v2466_v55  ;;  %v3574_v2 = vld [vmem:[#allocation5 + $0x44] sm:$0xf] }
  0x23   :  { %712 = vmatpush.bf16.msra.mxu1 %v2625_v33  ;;  %v2737_v46 = vor.u32 %v3648_v41, %v2736_v40  ;;  %v2464_v47 = vld [vmem:[#allocation5 + $0x60] sm:$0xf]  ;;  %v3580_v48 = vld [vmem:[#allocation5 + $0x6c] sm:$0xf0]  ;;  %v2450_v3 = vld [vmem:[#allocation5 + $0x50] sm:$0xf0] }
  0x24   :  { %725 = vmatpush.bf16.msra.mxu2 %v2753_v34  ;;  %v2592_v49 = vld [vmem:[#allocation5 + $0x160] sm:$0xf]  ;;  %738 = vmatpush.bf16.msra.mxu3 %v2501_v38  ;;  %v3612_v51 = vld [vmem:[#allocation5 + $0x16c] sm:$0xf0]  ;;  %v2465_v56 = vor.u32 %v3580_v48, %v2464_v47  ;;  %v2453_v10 = vor.u32 %v3574_v2, %v2450_v3  ;;  %v3570_v14 = vld [vmem:[#allocation5 + $0x24] sm:$0xf] }
  0x25   :  { %v2720_v52 = vld [vmem:[#allocation5 + $0x260] sm:$0xf]  ;;  %v3644_v53 = vld [vmem:[#allocation5 + $0x26c] sm:$0xf0]  ;;  %v2593_v57 = vor.u32 %v3612_v51, %v2592_v49  ;;  %v2434_v15 = vld [vmem:[#allocation5 + $0x30] sm:$0xf0] }
  0x26   :  { %700 = vmatpush.bf16.msra.mxu0 %v2481_v44  ;;  %v2721_v58 = vor.u32 %v3644_v53, %v2720_v52  ;;  %v2448_v59 = vld [vmem:[#allocation5 + $0x40] sm:$0xf]  ;;  %v3576_v60 = vld [vmem:[#allocation5 + $0x4c] sm:$0xf0]  ;;  %v2437_v24 = vor.u32 %v3570_v14, %v2434_v15  ;;  %v3566_v26 = vld [vmem:[#allocation5 + $0x4] sm:$0xf] }
  0x27   :  { %713 = vmatpush.bf16.msra.mxu1 %v2609_v45  ;;  %v2576_v61 = vld [vmem:[#allocation5 + $0x140] sm:$0xf]  ;;  %v3608_v63 = vld [vmem:[#allocation5 + $0x14c] sm:$0xf0]  ;;  %v2449_v4 = vor.u32 %v3576_v60, %v2448_v59  ;;  %v2418_v27 = vld [vmem:[#allocation5 + $0x10] sm:$0xf0] }
  0x28   :  { %726 = vmatpush.bf16.msra.mxu2 %v2737_v46  ;;  %739 = vmatpush.bf16.msra.mxu3 %v2485_v50  ;;  %v2704_v0 = vld [vmem:[#allocation5 + $0x240] sm:$0xf]  ;;  %v3640_v1 = vld [vmem:[#allocation5 + $0x24c] sm:$0xf0]  ;;  %v2577_v5 = vor.u32 %v3608_v63, %v2576_v61  ;;  %v3626_v28 = vld [vmem:[#allocation5 + $0x1e4] sm:$0xf]  ;;  %v2421_v39 = vor.u32 %v3566_v26, %v2418_v27 }
  0x29   :  { %v2705_v6 = vor.u32 %v3640_v1, %v2704_v0  ;;  %v2432_v7 = vld [vmem:[#allocation5 + $0x20] sm:$0xf]  ;;  %v3572_v8 = vld [vmem:[#allocation5 + $0x2c] sm:$0xf0]  ;;  %v2658_v29 = vld [vmem:[#allocation5 + $0x1f0] sm:$0xf0] }
  0x2a   :  { %701 = vmatpush.bf16.msra.mxu0 %v2465_v56  ;;  %v2560_v9 = vld [vmem:[#allocation5 + $0x120] sm:$0xf]  ;;  %v3604_v11 = vld [vmem:[#allocation5 + $0x12c] sm:$0xf0]  ;;  %v2433_v16 = vor.u32 %v3572_v8, %v2432_v7  ;;  %v3658_v30 = vld [vmem:[#allocation5 + $0x2e4] sm:$0xf]  ;;  %v2661_v40 = vor.u32 %v3626_v28, %v2658_v29 }
  0x2b   :  { %714 = vmatpush.bf16.msra.mxu1 %v2593_v57  ;;  %v2688_v12 = vld [vmem:[#allocation5 + $0x220] sm:$0xf]  ;;  %v3636_v13 = vld [vmem:[#allocation5 + $0x22c] sm:$0xf0]  ;;  %v2561_v19 = vor.u32 %v3604_v11, %v2560_v9  ;;  %v2786_v32 = vld [vmem:[#allocation5 + $0x2f0] sm:$0xf0] }
  0x2c   :  { %727 = vmatpush.bf16.msra.mxu2 %v2721_v58  ;;  %740 = vmatpush.bf16.msra.mxu3 %v2469_v62  ;;  %v2416_v17 = vld [vmem:[#allocation5] sm:$0xf]  ;;  %v3568_v18 = vld [vmem:[#allocation5 + $0xc] sm:$0xf0]  ;;  %v2689_v20 = vor.u32 %v3636_v13, %v2688_v12  ;;  %v2536_v33 = vld [vmem:[#allocation5 + $0xe8] sm:$0xf]  ;;  %v2789_v41 = vor.u32 %v3658_v30, %v2786_v32 }
  0x2d   :  { %v2544_v21 = vld [vmem:[#allocation5 + $0x100] sm:$0xf]  ;;  %v3600_v22 = vld [vmem:[#allocation5 + $0x10c] sm:$0xf0]  ;;  %v2417_v31 = vor.u32 %v3568_v18, %v2416_v17  ;;  %v3597_v34 = vld [vmem:[#allocation5 + $0xf4] sm:$0xf0] }
  0x2e   :  { %702 = vmatpush.bf16.msra.mxu0 %v2449_v4  ;;  %v2672_v23 = vld [vmem:[#allocation5 + $0x200] sm:$0xf]  ;;  %v3632_v25 = vld [vmem:[#allocation5 + $0x20c] sm:$0xf0]  ;;  %v2545_v35 = vor.u32 %v3600_v22, %v2544_v21  ;;  %v2664_v37 = vld [vmem:[#allocation5 + $0x1e8] sm:$0xf]  ;;  %v2537_v42 = vor.u32 %v3597_v34, %v2536_v33 }
  0x2f   :  { %715 = vmatpush.bf16.msra.mxu1 %v2577_v5  ;;  %v2673_v36 = vor.u32 %v3632_v25, %v2672_v23  ;;  %v3629_v38 = vld [vmem:[#allocation5 + $0x1f4] sm:$0xf0]  ;;  %v3622_v43 = vld [vmem:[#allocation5 + $0x1c4] sm:$0xf]  ;;  %v2642_v44 = vld [vmem:[#allocation5 + $0x1d0] sm:$0xf0] }
  0x30   :  { %728 = vmatpush.bf16.msra.mxu2 %v2705_v6  ;;  %741 = vmatpush.bf16.msra.mxu3 %v2453_v10  ;;  %v3654_v45 = vld [vmem:[#allocation5 + $0x2c4] sm:$0xf]  ;;  %v2665_v46 = vor.u32 %v3629_v38, %v2664_v37  ;;  %v2770_v47 = vld [vmem:[#allocation5 + $0x2d0] sm:$0xf0]  ;;  %v2520_v48 = vld [vmem:[#allocation5 + $0xc8] sm:$0xf]  ;;  %v2645_v53 = vor.u32 %v3622_v43, %v2642_v44 }
  0x31   :  { %v3593_v49 = vld [vmem:[#allocation5 + $0xd4] sm:$0xf0]  ;;  %v2648_v50 = vld [vmem:[#allocation5 + $0x1c8] sm:$0xf]  ;;  %v2773_v54 = vor.u32 %v3654_v45, %v2770_v47  ;;  %v3618_v56 = vld [vmem:[#allocation5 + $0x1a4] sm:$0xf] }
  0x32   :  { %703 = vmatpush.bf16.msra.mxu0 %v2433_v16  ;;  %v3625_v51 = vld [vmem:[#allocation5 + $0x1d4] sm:$0xf0]  ;;  %v2521_v55 = vor.u32 %v3593_v49, %v2520_v48  ;;  %v2626_v57 = vld [vmem:[#allocation5 + $0x1b0] sm:$0xf0]  ;;  %v3650_v58 = vld [vmem:[#allocation5 + $0x2a4] sm:$0xf] }
  0x33   :  { %716 = vmatpush.bf16.msra.mxu1 %v2561_v19  ;;  %v99_v52 = vld [vmem:[#allocation2] sm:$0x3f]  ;;  %v2649_v59 = vor.u32 %v3625_v51, %v2648_v50  ;;  %v2754_v60 = vld [vmem:[#allocation5 + $0x2b0] sm:$0xf0]  ;;  %v2504_v61 = vld [vmem:[#allocation5 + $0xa8] sm:$0xf]  ;;  %v2629_v1 = vor.u32 %v3618_v56, %v2626_v57 }
  0x34   :  { %729 = vmatpush.bf16.msra.mxu2 %v2689_v20  ;;  %742 = vmatpush.bf16.msra.mxu3 %v2437_v24  ;;  %101 = vst [vmem:[#allocation1] ss:$4 sm:$0xff] %v99_v52  ;;  %v3589_v62 = vld [vmem:[#allocation5 + $0xb4] sm:$0xf0]  ;;  %v2632_v63 = vld [vmem:[#allocation5 + $0x1a8] sm:$0xf]  ;;  %v2757_v5 = vor.u32 %v3650_v58, %v2754_v60 }
  0x35   :  { %v3621_v0 = vld [vmem:[#allocation5 + $0x1b4] sm:$0xf0]  ;;  %v3614_v2 = vld [vmem:[#allocation5 + $0x184] sm:$0xf]  ;;  %v2610_v3 = vld [vmem:[#allocation5 + $0x190] sm:$0xf0]  ;;  %v2505_v6 = vor.u32 %v3589_v62, %v2504_v61 }
  0x36   :  { %704 = vmatpush.bf16.msra.mxu0 %v2417_v31  ;;  %v3646_v4 = vld [vmem:[#allocation5 + $0x284] sm:$0xf]  ;;  %v2738_v7 = vld [vmem:[#allocation5 + $0x290] sm:$0xf0]  ;;  %v2488_v8 = vld [vmem:[#allocation5 + $0x88] sm:$0xf]  ;;  %v2633_v10 = vor.u32 %v3621_v0, %v2632_v63  ;;  %v2613_v16 = vor.u32 %v3614_v2, %v2610_v3 }
  0x37   :  { %717 = vmatpush.bf16.msra.mxu1 %v2545_v35  ;;  %v3585_v9 = vld [vmem:[#allocation5 + $0x94] sm:$0xf0]  ;;  %v2616_v11 = vld [vmem:[#allocation5 + $0x188] sm:$0xf]  ;;  %v3610_v18 = vld [vmem:[#allocation5 + $0x164] sm:$0xf]  ;;  %v2741_v21 = vor.u32 %v3646_v4, %v2738_v7 }
  0x38   :  { %730 = vmatpush.bf16.msra.mxu2 %v2673_v36  ;;  %743 = vmatpush.bf16.msra.mxu3 %v2421_v39  ;;  %v3617_v12 = vld [vmem:[#allocation5 + $0x194] sm:$0xf0]  ;;  %v868_v13 = vld [vmem:[#allocation8] sm:$0xff]  ;;  %v2489_v22 = vor.u32 %v3585_v9, %v2488_v8  ;;  %v2594_v23 = vld [vmem:[#allocation5 + $0x170] sm:$0xf0]  ;;  %vm860_vm0 = vcmask 1041408  }
  0x39   :  { %v3642_v24 = vld [vmem:[#allocation5 + $0x264] sm:$0xf]  ;;  %v2617_v26 = vor.u32 %v3617_v12, %v2616_v11  ;;  %v2722_v27 = vld [vmem:[#allocation5 + $0x270] sm:$0xf0]  ;;  %v2472_v28 = vld [vmem:[#allocation5 + $0x68] sm:$0xf]  ;;  %v2597_v32 = vor.u32 %v3610_v18, %v2594_v23 }
  0x3a   :  { %749 = vmatpush.bf16.msrb.mxu0 %v2661_v40  ;;  %v3581_v29 = vld [vmem:[#allocation5 + $0x74] sm:$0xf0]  ;;  %v2600_v30 = vld [vmem:[#allocation5 + $0x168] sm:$0xf]  ;;  %v2725_v33 = vor.u32 %v3642_v24, %v2722_v27  ;;  %v3606_v35 = vld [vmem:[#allocation5 + $0x144] sm:$0xf] }
  0x3b   :  { %762 = vmatpush.bf16.msrb.mxu1 %v2789_v41  ;;  %v102_v14 = vld.sshfl [vmem:[#allocation1] sm:$0xff pattern:$0x73625140]  ;;  %v103_v15 = vld.sshfl [vmem:[#allocation1 + $0x8] sm:$0xff pattern:$0x73625140]  ;;  %v2473_v34 = vor.u32 %v3581_v29, %v2472_v28 }
  0x3c   :  { %775 = vmatpush.bf16.msrb.mxu2 %v2537_v42  ;;  %788 = vmatpush.bf16.msrb.mxu3 %v2665_v46  ;;  %v4105_v17 = vpack.c.bf16 %v102_v14, %v102_v14  ;;  %v4107_v19 = vpack.c.bf16 %v103_v15, %v103_v15  ;;  %v104_v20 = vld.sshfl [vmem:[#allocation1 + $0x10] sm:$0xff pattern:$0x73625140]  ;;  %v3613_v31 = vld [vmem:[#allocation5 + $0x174] sm:$0xf0]  ;;  %vm862_vm1 = vcmask 1045508  }
  0x3d   :  { %v4109_v25 = vpack.c.bf16 %v104_v20, %v104_v20  ;;  %872 = vst [vmem:[#allocation1] ss:$4 sm:$0xff] %v868_v13  ;;  %v2578_v36 = vld [vmem:[#allocation5 + $0x150] sm:$0xf0]  ;;  %v3638_v37 = vld [vmem:[#allocation5 + $0x244] sm:$0xf]  ;;  %v2601_v38 = vor.u32 %v3613_v31, %v2600_v30 }
  0x3e   :  { %750 = vmatpush.bf16.msrb.mxu0 %v2645_v53  ;;  %718 = vmatmul.bf16.vlgmr.msra.gmra.mxu1 %v4107_v19  ;;  %v2706_v39 = vld [vmem:[#allocation5 + $0x250] sm:$0xf0]  ;;  %v2456_v40 = vld [vmem:[#allocation5 + $0x48] sm:$0xf]  ;;  %v3577_v41 = vld [vmem:[#allocation5 + $0x54] sm:$0xf0]  ;;  %v2581_v44 = vor.u32 %v3606_v35, %v2578_v36 }
  0x3f   :  { %763 = vmatpush.bf16.msrb.mxu1 %v2773_v54  ;;  %705 = vmatmul.bf16.vlgmr.msra.gmra.mxu0 %v4105_v17  ;;  %v2584_v42 = vld [vmem:[#allocation5 + $0x148] sm:$0xf]  ;;  %v3609_v43 = vld [vmem:[#allocation5 + $0x154] sm:$0xf0]  ;;  %v2709_v45 = vor.u32 %v3638_v37, %v2706_v39  ;;  %v2457_v46 = vor.u32 %v3577_v41, %v2456_v40  ;;  %v3602_v47 = vld [vmem:[#allocation5 + $0x124] sm:$0xf] }
  0x40   :  { %776 = vmatpush.bf16.msrb.mxu2 %v2521_v55  ;;  %789 = vmatpush.bf16.msrb.mxu3 %v2649_v59  ;;  %v2562_v48 = vld [vmem:[#allocation5 + $0x130] sm:$0xf0]  ;;  %v3634_v49 = vld [vmem:[#allocation5 + $0x224] sm:$0xf]  ;;  %v2585_v50 = vor.u32 %v3609_v43, %v2584_v42  ;;  %v2440_v52 = vld [vmem:[#allocation5 + $0x28] sm:$0xf] }
  0x41   :  { %731 = vmatmul.bf16.vlgmr.msra.gmra.mxu2 %v4109_v25  ;;  %744 = vmatmul.bf16.vlgmr.msra.gmra.mxu3 %v4105_v17  ;;  %v2690_v51 = vld [vmem:[#allocation5 + $0x230] sm:$0xf0]  ;;  %v3573_v53 = vld [vmem:[#allocation5 + $0x34] sm:$0xf0]  ;;  %v2568_v54 = vld [vmem:[#allocation5 + $0x128] sm:$0xf]  ;;  %v2565_v56 = vor.u32 %v3602_v47, %v2562_v48 }
  0x42   :  { %751 = vmatpush.bf16.msrb.mxu0 %v2629_v1  ;;  %v3605_v55 = vld [vmem:[#allocation5 + $0x134] sm:$0xf0]  ;;  %v3598_v57 = vld [vmem:[#allocation5 + $0x104] sm:$0xf]  ;;  %v2546_v58 = vld [vmem:[#allocation5 + $0x110] sm:$0xf0]  ;;  %v2693_v59 = vor.u32 %v3634_v49, %v2690_v51  ;;  %v2441_v60 = vor.u32 %v3573_v53, %v2440_v52 }
  0x43   :  { %764 = vmatpush.bf16.msrb.mxu1 %v2757_v5  ;;  %v3630_v61 = vld [vmem:[#allocation5 + $0x204] sm:$0xf]  ;;  %v2674_v62 = vld [vmem:[#allocation5 + $0x210] sm:$0xf0]  ;;  %v2424_v63 = vld [vmem:[#allocation5 + $0x8] sm:$0xf]  ;;  %v2569_v0 = vor.u32 %v3605_v55, %v2568_v54  ;;  %v2549_v7 = vor.u32 %v3598_v57, %v2546_v58 }
  0x44   :  { %777 = vmatpush.bf16.msrb.mxu2 %v2505_v6  ;;  %790 = vmatpush.bf16.msrb.mxu3 %v2633_v10  ;;  %v3569_v1 = vld [vmem:[#allocation5 + $0x14] sm:$0xf0]  ;;  %v2552_v2 = vld [vmem:[#allocation5 + $0x108] sm:$0xf]  ;;  %v3595_v6 = vld [vmem:[#allocation5 + $0xec] sm:$0xf]  ;;  %v2677_v11 = vor.u32 %v3630_v61, %v2674_v62 }
  0x45   :  { %v3601_v3 = vld [vmem:[#allocation5 + $0x114] sm:$0xf0]  ;;  %v2792_v4 = vld [vmem:[#allocation5 + $0x2e8] sm:$0xf]  ;;  %v2538_v8 = vld [vmem:[#allocation5 + $0xf8] sm:$0xf0]  ;;  %v2425_v12 = vor.u32 %v3569_v1, %v2424_v63 }
  0x46   :  { %752 = vmatpush.bf16.msrb.mxu0 %v2613_v16  ;;  %v3661_v5 = vld [vmem:[#allocation5 + $0x2f4] sm:$0xf0]  ;;  %v3627_v9 = vld [vmem:[#allocation5 + $0x1ec] sm:$0xf]  ;;  %v2666_v10 = vld [vmem:[#allocation5 + $0x1f8] sm:$0xf0]  ;;  %v2553_v15 = vor.u32 %v3601_v3, %v2552_v2  ;;  %v2541_v18 = vor.u32 %v3595_v6, %v2538_v8 }
  0x47   :  { %765 = vmatpush.bf16.msrb.mxu1 %v2741_v21  ;;  %v3659_v13 = vld [vmem:[#allocation5 + $0x2ec] sm:$0xf]  ;;  %v2794_v14 = vld [vmem:[#allocation5 + $0x2f8] sm:$0xf0]  ;;  %v2793_v16 = vor.u32 %v3661_v5, %v2792_v4  ;;  %v2669_v20 = vor.u32 %v3627_v9, %v2666_v10  ;;  %v2776_v21 = vld [vmem:[#allocation5 + $0x2c8] sm:$0xf] }
  0x48   :  { %778 = vmatpush.bf16.msrb.mxu2 %v2489_v22  ;;  %791 = vmatpush.bf16.msrb.mxu3 %v2617_v26  ;;  %v3657_v22 = vld [vmem:[#allocation5 + $0x2d4] sm:$0xf0]  ;;  %v3591_v23 = vld [vmem:[#allocation5 + $0xcc] sm:$0xf]  ;;  %v2797_v24 = vor.u32 %v3659_v13, %v2794_v14  ;;  %v2522_v26 = vld [vmem:[#allocation5 + $0xd8] sm:$0xf0] }
  0x49   :  { %v3623_v27 = vld [vmem:[#allocation5 + $0x1cc] sm:$0xf]  ;;  %v2650_v28 = vld [vmem:[#allocation5 + $0x1d8] sm:$0xf0]  ;;  %v2777_v31 = vor.u32 %v3657_v22, %v2776_v21  ;;  %v3653_v35 = vld [vmem:[#allocation5 + $0x2b4] sm:$0xf0] }
  0x4a   :  { %753 = vmatpush.bf16.msrb.mxu0 %v2597_v32  ;;  %v3655_v29 = vld [vmem:[#allocation5 + $0x2cc] sm:$0xf]  ;;  %v2778_v30 = vld [vmem:[#allocation5 + $0x2d8] sm:$0xf0]  ;;  %v2525_v32 = vor.u32 %v3591_v23, %v2522_v26  ;;  %v3649_v47 = vld [vmem:[#allocation5 + $0x294] sm:$0xf0] }
  0x4b   :  { %766 = vmatpush.bf16.msrb.mxu1 %v2725_v33  ;;  %v2653_v33 = vor.u32 %v3623_v27, %v2650_v28  ;;  %v3587_v36 = vld [vmem:[#allocation5 + $0xac] sm:$0xf]  ;;  %v2781_v37 = vor.u32 %v3655_v29, %v2778_v30  ;;  %v2634_v40 = vld [vmem:[#allocation5 + $0x1b8] sm:$0xf0]  ;;  %v2728_v58 = vld [vmem:[#allocation5 + $0x268] sm:$0xf] }
  0x4c   :  { %779 = vmatpush.bf16.msrb.mxu2 %v2473_v34  ;;  %792 = vmatpush.bf16.msrb.mxu3 %v2601_v38  ;;  %v2760_v34 = vld [vmem:[#allocation5 + $0x2a8] sm:$0xf]  ;;  %v2506_v38 = vld [vmem:[#allocation5 + $0xb8] sm:$0xf0]  ;;  %v3619_v39 = vld [vmem:[#allocation5 + $0x1ac] sm:$0xf] }
  0x4d   :  { %v3651_v41 = vld [vmem:[#allocation5 + $0x2ac] sm:$0xf]  ;;  %v2762_v42 = vld [vmem:[#allocation5 + $0x2b8] sm:$0xf0]  ;;  %v2761_v43 = vor.u32 %v3653_v35, %v2760_v34  ;;  %v2712_v6 = vld [vmem:[#allocation5 + $0x248] sm:$0xf] }
  0x4e   :  { %754 = vmatpush.bf16.msrb.mxu0 %v2581_v44  ;;  %v2509_v44 = vor.u32 %v3587_v36, %v2506_v38  ;;  %v3583_v48 = vld [vmem:[#allocation5 + $0x8c] sm:$0xf]  ;;  %v2765_v49 = vor.u32 %v3651_v41, %v2762_v42  ;;  %v2618_v52 = vld [vmem:[#allocation5 + $0x198] sm:$0xf0]  ;;  %v3637_v21 = vld [vmem:[#allocation5 + $0x234] sm:$0xf0] }
  0x4f   :  { %767 = vmatpush.bf16.msrb.mxu1 %v2709_v45  ;;  %v2637_v45 = vor.u32 %v3619_v39, %v2634_v40  ;;  %v3615_v51 = vld [vmem:[#allocation5 + $0x18c] sm:$0xf]  ;;  %v2746_v54 = vld [vmem:[#allocation5 + $0x298] sm:$0xf0]  ;;  %v2912_v42 = vld [vmem:[#allocation10 + $0xe0] sm:$0xf] }
  0x50   :  { %780 = vmatpush.bf16.msrb.mxu2 %v2457_v46  ;;  %793 = vmatpush.bf16.msrb.mxu3 %v2585_v50  ;;  %v2744_v46 = vld [vmem:[#allocation5 + $0x288] sm:$0xf]  ;;  %v2490_v50 = vld [vmem:[#allocation5 + $0x98] sm:$0xf0]  ;;  %v3647_v53 = vld [vmem:[#allocation5 + $0x28c] sm:$0xf]  ;;  %v2621_v57 = vor.u32 %v3615_v51, %v2618_v52 }
  0x51   :  { %v2745_v55 = vor.u32 %v3649_v47, %v2744_v46  ;;  %v2749_v61 = vor.u32 %v3647_v53, %v2746_v54  ;;  %v2474_v62 = vld [vmem:[#allocation5 + $0x78] sm:$0xf0]  ;;  %v3611_v63 = vld [vmem:[#allocation5 + $0x16c] sm:$0xf]  ;;  %v3724_v46 = vld [vmem:[#allocation10 + $0x1ec] sm:$0xf0] }
  0x52   :  { %755 = vmatpush.bf16.msrb.mxu0 %v2565_v56  ;;  %v2493_v56 = vor.u32 %v3583_v48, %v2490_v50  ;;  %v3643_v1 = vld [vmem:[#allocation5 + $0x26c] sm:$0xf]  ;;  %v2730_v2 = vld [vmem:[#allocation5 + $0x278] sm:$0xf0]  ;;  %v3168_v47 = vld [vmem:[#allocation10 + $0x2e0] sm:$0xf] }
  0x53   :  { %768 = vmatpush.bf16.msrb.mxu1 %v2693_v59  ;;  %v3645_v59 = vld [vmem:[#allocation5 + $0x274] sm:$0xf0]  ;;  %v3575_v8 = vld [vmem:[#allocation5 + $0x4c] sm:$0xf]  ;;  %v2733_v9 = vor.u32 %v3643_v1, %v2730_v2  ;;  %v2458_v10 = vld [vmem:[#allocation5 + $0x58] sm:$0xf0] }
  0x54   :  { %781 = vmatpush.bf16.msrb.mxu2 %v2441_v60  ;;  %794 = vmatpush.bf16.msrb.mxu3 %v2569_v0  ;;  %v3579_v60 = vld [vmem:[#allocation5 + $0x6c] sm:$0xf]  ;;  %v2602_v0 = vld [vmem:[#allocation5 + $0x178] sm:$0xf0]  ;;  %v2729_v3 = vor.u32 %v3645_v59, %v2728_v58  ;;  %v3756_v48 = vld [vmem:[#allocation10 + $0x2ec] sm:$0xf0] }
  0x55   :  { %v2477_v4 = vor.u32 %v3579_v60, %v2474_v62  ;;  %v2605_v5 = vor.u32 %v3611_v63, %v2602_v0  ;;  %v3639_v13 = vld [vmem:[#allocation5 + $0x24c] sm:$0xf]  ;;  %v2714_v14 = vld [vmem:[#allocation5 + $0x258] sm:$0xf0]  ;;  %v3296_v51 = vld [vmem:[#allocation10 + $0x3e0] sm:$0xf] }
  0x56   :  { %756 = vmatpush.bf16.msrb.mxu0 %v2549_v7  ;;  %v3641_v7 = vld [vmem:[#allocation5 + $0x254] sm:$0xf0]  ;;  %v3571_v22 = vld [vmem:[#allocation5 + $0x2c] sm:$0xf]  ;;  %v2717_v23 = vor.u32 %v3639_v13, %v2714_v14  ;;  %v2570_v27 = vld [vmem:[#allocation5 + $0x138] sm:$0xf0] }
  0x57   :  { %769 = vmatpush.bf16.msrb.mxu1 %v2677_v11  ;;  %v3607_v11 = vld [vmem:[#allocation5 + $0x14c] sm:$0xf]  ;;  %v2698_v29 = vld [vmem:[#allocation5 + $0x238] sm:$0xf0]  ;;  %v3788_v52 = vld [vmem:[#allocation10 + $0x3ec] sm:$0xf0] }
  0x58   :  { %782 = vmatpush.bf16.msrb.mxu2 %v2425_v12  ;;  %795 = vmatpush.bf16.msrb.mxu3 %v2553_v15  ;;  %v2586_v12 = vld [vmem:[#allocation5 + $0x158] sm:$0xf0]  ;;  %v2713_v15 = vor.u32 %v3641_v7, %v2712_v6  ;;  %v3603_v26 = vld [vmem:[#allocation5 + $0x12c] sm:$0xf]  ;;  %v3688_v58 = vld [vmem:[#allocation10 + $0xcc] sm:$0xf0]  ;;  %v3297_v60 = vor.u32 %v3788_v52, %v3296_v51 }
  0x59   :  { %757 = vmatmul.bf16.vlgmr.msrb.gmra.mxu0 %v4107_v19  ;;  %v3635_v28 = vld [vmem:[#allocation5 + $0x22c] sm:$0xf]  ;;  %v2573_v34 = vor.u32 %v3603_v26, %v2570_v27  ;;  %v2426_v36 = vld [vmem:[#allocation5 + $0x18] sm:$0xf0]  ;;  %v3024_v59 = vld [vmem:[#allocation10 + $0x1c0] sm:$0xf] }
  0x5a   :  { %801 = vmatpush.bf16.msra.mxu0 %v2793_v16  ;;  %770 = vmatmul.bf16.vlgmr.msrb.gmra.mxu1 %v4109_v25  ;;  %v2461_v16 = vor.u32 %v3575_v8, %v2458_v10  ;;  %v3567_v35 = vld [vmem:[#allocation5 + $0xc] sm:$0xf]  ;;  %v2701_v38 = vor.u32 %v3635_v28, %v2698_v29  ;;  %v2554_v39 = vld [vmem:[#allocation5 + $0x118] sm:$0xf0]  ;;  %v3152_v62 = vld [vmem:[#allocation10 + $0x2c0] sm:$0xf] }
  0x5b   :  { %814 = vmatpush.bf16.msra.mxu1 %v2541_v18  ;;  %783 = vmatmul.bf16.vlgmr.msrb.gmra.mxu2 %v4105_v17  ;;  %v2589_v18 = vor.u32 %v3607_v11, %v2586_v12  ;;  %v3631_v40 = vld [vmem:[#allocation5 + $0x20c] sm:$0xf]  ;;  %v2682_v41 = vld [vmem:[#allocation5 + $0x218] sm:$0xf0]  ;;  %v3752_v63 = vld [vmem:[#allocation10 + $0x2cc] sm:$0xf0] }
  0x5c   :  { %827 = vmatpush.bf16.msra.mxu2 %v2669_v20  ;;  %840 = vmatpush.bf16.msra.mxu3 %v2797_v24  ;;  %v2696_v20 = vld [vmem:[#allocation5 + $0x228] sm:$0xf]  ;;  %v2442_v24 = vld [vmem:[#allocation5 + $0x38] sm:$0xf0]  ;;  %v2685_v53 = vor.u32 %v3631_v40, %v2682_v41  ;;  %v3280_v0 = vld [vmem:[#allocation10 + $0x3c0] sm:$0xf] }
  0x5d   :  { %796 = vmatmul.bf16.vlgmr.msrb.gmra.mxu3 %v4107_v19  ;;  %v2697_v30 = vor.u32 %v3637_v21, %v2696_v20  ;;  %v3784_v1 = vld [vmem:[#allocation10 + $0x3cc] sm:$0xf0]  ;;  %v3008_v7 = vld [vmem:[#allocation10 + $0x1a0] sm:$0xf]  ;;  %vm864_vm2 = vcmask 1043456   ;;  %s2386_s28 = sshll.u32 %s4216_s6, 4  ;;  %s2387_s28 = int_to_ptr.hbm [resolvable:$true] %s2386_s28 }
  0x5e   :  { %802 = vmatpush.bf16.msra.mxu0 %v2777_v31  ;;  %v2680_v31 = vld [vmem:[#allocation5 + $0x208] sm:$0xf]  ;;  %v3684_v6 = vld [vmem:[#allocation10 + $0xac] sm:$0xf0]  ;;  %v3281_v8 = vor.u32 %v3784_v1, %v3280_v0  ;;  %v3136_v10 = vld [vmem:[#allocation10 + $0x2a0] sm:$0xf] }
  0x5f   :  { %815 = vmatpush.bf16.msra.mxu1 %v2525_v32  ;;  %v3633_v32 = vld [vmem:[#allocation5 + $0x214] sm:$0xf0]  ;;  %v3748_v11 = vld [vmem:[#allocation10 + $0x2ac] sm:$0xf0]  ;;  %v3264_v12 = vld [vmem:[#allocation10 + $0x3a0] sm:$0xf] }
  0x60   :  { %828 = vmatpush.bf16.msra.mxu2 %v2653_v33  ;;  %841 = vmatpush.bf16.msra.mxu3 %v2781_v37  ;;  %v2445_v33 = vor.u32 %v3571_v22, %v2442_v24  ;;  %v3599_v37 = vld [vmem:[#allocation5 + $0x10c] sm:$0xf]  ;;  %v3780_v13 = vld [vmem:[#allocation10 + $0x3ac] sm:$0xf0]  ;;  %v2992_v21 = vld [vmem:[#allocation10 + $0x180] sm:$0xf] }
  0x61   :  { %v2557_v50 = vor.u32 %v3599_v37, %v2554_v39  ;;  %v3680_v20 = vld [vmem:[#allocation10 + $0x8c] sm:$0xf0]  ;;  %v3248_v26 = vld [vmem:[#allocation10 + $0x380] sm:$0xf]  ;;  %s4049_s6 = smov [#allocation12]   ;;  %s2397_s9 = sshll.u32 %s4217_s7, 4  ;;  %s2398_s9 = int_to_ptr.hbm [resolvable:$true] %s2397_s9 }
  0x62   :  { %803 = vmatpush.bf16.msra.mxu0 %v2761_v43  ;;  %v3692_v43 = vld [vmem:[#allocation10 + $0xec] sm:$0xf0]  ;;  %v2832_v41 = vld [vmem:[#allocation10 + $0x40] sm:$0xf]  ;;  %s2395_s29 = sshll.u32 %s4049_s6, 4  ;;  %s2396_s29 = int_to_ptr.vmem [resolvable:$true] %s2395_s29 }
  0x63   :  { %816 = vmatpush.bf16.msra.mxu1 %v2509_v44  ;;  %v3040_v44 = vld [vmem:[#allocation10 + $0x1e0] sm:$0xf]  ;;  %v2913_v54 = vor.u32 %v3692_v43, %v2912_v42  ;;  %v3712_v22 = vld [vmem:[#allocation10 + $0x18c] sm:$0xf0] }
  0x64   :  { %829 = vmatpush.bf16.msra.mxu2 %v2637_v45  ;;  %842 = vmatpush.bf16.msra.mxu3 %v2765_v49  ;;  %v2681_v45 = vor.u32 %v3633_v32, %v2680_v31  ;;  %v2429_v49 = vor.u32 %v3567_v35, %v2426_v36  ;;  %v3744_v24 = vld [vmem:[#allocation10 + $0x28c] sm:$0xf0]  ;;  %v2993_v28 = vor.u32 %v3712_v22, %v2992_v21  ;;  %v2976_v32 = vld [vmem:[#allocation10 + $0x160] sm:$0xf] }
  0x65   :  { %v3676_v31 = vld [vmem:[#allocation10 + $0x6c] sm:$0xf0]  ;;  %v3104_v35 = vld [vmem:[#allocation10 + $0x260] sm:$0xf] }
  0x66   :  { %804 = vmatpush.bf16.msra.mxu0 %v2745_v55  ;;  %v3041_v55 = vor.u32 %v3724_v46, %v3040_v44  ;;  %v3740_v36 = vld [vmem:[#allocation10 + $0x26c] sm:$0xf0]  ;;  %v2960_v43 = vld [vmem:[#allocation10 + $0x140] sm:$0xf] }
  0x67   :  { %817 = vmatpush.bf16.msra.mxu1 %v2493_v56  ;;  %v3169_v56 = vor.u32 %v3756_v48, %v3168_v47  ;;  %v3772_v37 = vld [vmem:[#allocation10 + $0x36c] sm:$0xf0]  ;;  %v3105_v40 = vor.u32 %v3740_v36, %v3104_v35  ;;  %v3088_v46 = vld [vmem:[#allocation10 + $0x240] sm:$0xf]  ;;  %v3686_v35 = vld [vmem:[#allocation10 + $0xc4] sm:$0xf] }
  0x68   :  { %830 = vmatpush.bf16.msra.mxu2 %v2621_v57  ;;  %843 = vmatpush.bf16.msra.mxu3 %v2749_v61  ;;  %v2896_v57 = vld [vmem:[#allocation10 + $0xc0] sm:$0xf]  ;;  %v3720_v61 = vld [vmem:[#allocation10 + $0x1cc] sm:$0xf0]  ;;  %v2898_v36 = vld [vmem:[#allocation10 + $0xd0] sm:$0xf0] }
  0x69   :  { %v2897_v2 = vor.u32 %v3688_v58, %v2896_v57  ;;  %v3672_v42 = vld [vmem:[#allocation10 + $0x4c] sm:$0xf0]  ;;  %v3216_v48 = vld [vmem:[#allocation10 + $0x340] sm:$0xf] }
  0x6a   :  { %805 = vmatpush.bf16.msra.mxu0 %v2729_v3  ;;  %v3025_v3 = vor.u32 %v3720_v61, %v3024_v59  ;;  %v3736_v47 = vld [vmem:[#allocation10 + $0x24c] sm:$0xf0]  ;;  %v3072_v58 = vld [vmem:[#allocation10 + $0x220] sm:$0xf] }
  0x6b   :  { %818 = vmatpush.bf16.msra.mxu1 %v2477_v4  ;;  %v3153_v4 = vor.u32 %v3752_v63, %v3152_v62  ;;  %v3089_v52 = vor.u32 %v3736_v47, %v3088_v46  ;;  %v3700_v57 = vld [vmem:[#allocation10 + $0x12c] sm:$0xf0]  ;;  %v2800_v62 = vld [vmem:[#allocation10] sm:$0xf] }
  0x6c   :  { %831 = vmatpush.bf16.msra.mxu2 %v2605_v5  ;;  %844 = vmatpush.bf16.msra.mxu3 %v2733_v9  ;;  %v2880_v5 = vld [vmem:[#allocation10 + $0xa0] sm:$0xf]  ;;  %v3716_v9 = vld [vmem:[#allocation10 + $0x1ac] sm:$0xf0] }
  0x6d   :  { %v2881_v14 = vor.u32 %v3684_v6, %v2880_v5  ;;  %v3732_v59 = vld [vmem:[#allocation10 + $0x22c] sm:$0xf0]  ;;  %v2928_v1 = vld [vmem:[#allocation10 + $0x100] sm:$0xf] }
  0x6e   :  { %806 = vmatpush.bf16.msra.mxu0 %v2713_v15  ;;  %v3009_v15 = vor.u32 %v3716_v9, %v3008_v7  ;;  %v3764_v61 = vld [vmem:[#allocation10 + $0x32c] sm:$0xf0]  ;;  %v3056_v5 = vld [vmem:[#allocation10 + $0x200] sm:$0xf] }
  0x6f   :  { %819 = vmatpush.bf16.msra.mxu1 %v2461_v16  ;;  %v3137_v16 = vor.u32 %v3748_v11, %v3136_v10  ;;  %v3664_v0 = vld [vmem:[#allocation10 + $0xc] sm:$0xf0]  ;;  %v3184_v7 = vld [vmem:[#allocation10 + $0x300] sm:$0xf] }
  0x70   :  { %832 = vmatpush.bf16.msra.mxu2 %v2589_v18  ;;  %845 = vmatpush.bf16.msra.mxu3 %v2717_v23  ;;  %v2864_v18 = vld [vmem:[#allocation10 + $0x80] sm:$0xf]  ;;  %v3728_v6 = vld [vmem:[#allocation10 + $0x20c] sm:$0xf0] }
  0x71   :  { %v3120_v23 = vld [vmem:[#allocation10 + $0x280] sm:$0xf]  ;;  %v2865_v27 = vor.u32 %v3680_v20, %v2864_v18  ;;  %v3760_v9 = vld [vmem:[#allocation10 + $0x30c] sm:$0xf0]  ;;  %v3722_v18 = vld [vmem:[#allocation10 + $0x1e4] sm:$0xf] }
  0x72   :  { %807 = vmatpush.bf16.msra.mxu0 %v2697_v30  ;;  %v3121_v29 = vor.u32 %v3744_v24, %v3120_v23  ;;  %v2848_v30 = vld [vmem:[#allocation10 + $0x60] sm:$0xf]  ;;  %v3820_v11 = vld [vmem:[#allocation10 + $0x4ec] sm:$0xf0]  ;;  %v3042_v20 = vld [vmem:[#allocation10 + $0x1f0] sm:$0xf0] }
  0x73   :  { %820 = vmatpush.bf16.msra.mxu1 %v2445_v33  ;;  %v3424_v10 = vld [vmem:[#allocation10 + $0x4e0] sm:$0xf]  ;;  %v3816_v23 = vld [vmem:[#allocation10 + $0x4cc] sm:$0xf0] }
  0x74   :  { %833 = vmatpush.bf16.msra.mxu2 %v2573_v34  ;;  %846 = vmatpush.bf16.msra.mxu3 %v2701_v38  ;;  %v3708_v34 = vld [vmem:[#allocation10 + $0x16c] sm:$0xf0]  ;;  %v2849_v38 = vor.u32 %v3676_v31, %v2848_v30  ;;  %v3408_v22 = vld [vmem:[#allocation10 + $0x4c0] sm:$0xf] }
  0x75   :  { %v2977_v39 = vor.u32 %v3708_v34, %v2976_v32  ;;  %v877_v24 = vld.sshfl [vmem:[#allocation1 + $0x10] sm:$0xff pattern:$0x73625140]  ;;  %v3536_v31 = vld [vmem:[#allocation10 + $0x5c0] sm:$0xf] }
  0x76   :  { %808 = vmatpush.bf16.msra.mxu0 %v2681_v45  ;;  %v3704_v45 = vld [vmem:[#allocation10 + $0x14c] sm:$0xf0]  ;;  %v3392_v46 = vld [vmem:[#allocation10 + $0x4a0] sm:$0xf] }
  0x77   :  { %821 = vmatpush.bf16.msra.mxu1 %v2429_v49  ;;  %v3768_v49 = vld [vmem:[#allocation10 + $0x34c] sm:$0xf0]  ;;  %v2961_v51 = vor.u32 %v3704_v45, %v2960_v43  ;;  %v869_v43 = vld [vmem:[#allocation8 + $0x8] sm:$0xf]  ;;  %v2901_v45 = vor.u32 %v3686_v35, %v2898_v36  ;;  %v3666_v36 = vld [vmem:[#allocation10 + $0x24] sm:$0xf] }
  0x78   :  { %834 = vmatpush.bf16.msra.mxu2 %v2557_v50  ;;  %847 = vmatpush.bf16.msra.mxu3 %v2685_v53  ;;  %v2833_v50 = vor.u32 %v3672_v42, %v2832_v41  ;;  %v2816_v53 = vld [vmem:[#allocation10 + $0x20] sm:$0xf]  ;;  %v876_v32 = vld.sshfl [vmem:[#allocation1 + $0x8] sm:$0xff pattern:$0x73625140]  ;;  %v3409_v41 = vor.u32 %v3816_v23, %v3408_v22 }
  0x79   :  { %809 = vmatmul.bf16.vlgmr.msra.gmra.mxu0 %v4109_v25  ;;  %v3848_v34 = vld [vmem:[#allocation10 + $0x5cc] sm:$0xf0]  ;;  %v4129_v42 = vpack.c.bf16 %v876_v32, %v876_v32  ;;  %874 = vst [vmem:[#allocation1 + $0x20] ss:$4 sm:$0xff] %v869_v43 }
  0x7a   :  { %2055 = vmatpush.bf16.msrb.mxu0 %v2913_v54  ;;  %822 = vmatmul.bf16.vlgmr.msra.gmra.mxu1 %v4105_v17  ;;  %v3776_v17 = vld [vmem:[#allocation10 + $0x38c] sm:$0xf0] }
  0x7b   :  { %2068 = vmatpush.bf16.msrb.mxu1 %v3041_v55  ;;  %835 = vmatmul.bf16.vlgmr.msra.gmra.mxu2 %v4107_v19  ;;  %v3265_v19 = vor.u32 %v3780_v13, %v3264_v12  ;;  %v3249_v33 = vor.u32 %v3776_v17, %v3248_v26  ;;  %v3668_v54 = vld [vmem:[#allocation10 + $0x2c] sm:$0xf0]  ;;  %v2944_v55 = vld [vmem:[#allocation10 + $0x120] sm:$0xf]  ;;  %v3185_v26 = vor.u32 %v3760_v9, %v3184_v7 }
  0x7c   :  { %2081 = vmatpush.bf16.msrb.mxu2 %v3169_v56  ;;  %2094 = vmatpush.bf16.msrb.mxu3 %v3297_v60  ;;  %v3217_v56 = vor.u32 %v3768_v49, %v3216_v48  ;;  %v3200_v60 = vld [vmem:[#allocation10 + $0x320] sm:$0xf]  ;;  %v2817_v63 = vor.u32 %v3668_v54, %v2816_v53  ;;  %v3852_v13 = vld [vmem:[#allocation10 + $0x5ec] sm:$0xf0]  ;;  %v3425_v17 = vor.u32 %v3820_v11, %v3424_v10  ;;  %v3714_v53 = vld [vmem:[#allocation10 + $0x1a4] sm:$0xf] }
  0x7d   :  { %848 = vmatmul.bf16.vlgmr.msra.gmra.mxu3 %v4109_v25  ;;  %v3232_v25 = vld [vmem:[#allocation10 + $0x360] sm:$0xf]  ;;  %v3812_v47 = vld [vmem:[#allocation10 + $0x4ac] sm:$0xf0]  ;;  %v3010_v54 = vld [vmem:[#allocation10 + $0x1b0] sm:$0xf0] }
  0x7e   :  { %2056 = vmatpush.bf16.msrb.mxu0 %v2897_v2  ;;  %v3233_v44 = vor.u32 %v3772_v37, %v3232_v25  ;;  %v3696_v2 = vld [vmem:[#allocation10 + $0x10c] sm:$0xf0]  ;;  %v3552_v12 = vld [vmem:[#allocation10 + $0x5e0] sm:$0xf]  ;;  %v4123_v25 = vpack.c.bf16 %v877_v24, %v877_v24  ;;  %v3718_v37 = vld [vmem:[#allocation10 + $0x1c4] sm:$0xf] }
  0x7f   :  { %2069 = vmatpush.bf16.msrb.mxu1 %v3025_v3  ;;  %v2945_v3 = vor.u32 %v3700_v57, %v2944_v55  ;;  %v2929_v21 = vor.u32 %v3696_v2, %v2928_v1  ;;  %v3520_v48 = vld [vmem:[#allocation10 + $0x5a0] sm:$0xf]  ;;  %v3393_v55 = vor.u32 %v3812_v47, %v3392_v46  ;;  %v3710_v1 = vld [vmem:[#allocation10 + $0x184] sm:$0xf]  ;;  %v2994_v2 = vld [vmem:[#allocation10 + $0x190] sm:$0xf0] }
  0x80   :  { %2082 = vmatpush.bf16.msrb.mxu2 %v3153_v4  ;;  %2095 = vmatpush.bf16.msrb.mxu3 %v3281_v8  ;;  %v3073_v4 = vor.u32 %v3732_v59, %v3072_v58  ;;  %v3201_v8 = vor.u32 %v3764_v61, %v3200_v60  ;;  %v3376_v58 = vld [vmem:[#allocation10 + $0x480] sm:$0xf]  ;;  %v3808_v59 = vld [vmem:[#allocation10 + $0x48c] sm:$0xf0]  ;;  %v3013_v61 = vor.u32 %v3714_v53, %v3010_v54  ;;  %v3674_v11 = vld [vmem:[#allocation10 + $0x64] sm:$0xf] }
  0x81   :  { %v3504_v60 = vld [vmem:[#allocation10 + $0x580] sm:$0xf]  ;;  %v3804_v7 = vld [vmem:[#allocation10 + $0x46c] sm:$0xf0]  ;;  %v2997_v9 = vor.u32 %v3710_v1, %v2994_v2  ;;  %v3670_v24 = vld [vmem:[#allocation10 + $0x44] sm:$0xf] }
  0x82   :  { %2057 = vmatpush.bf16.msrb.mxu0 %v2881_v14  ;;  %v3690_v14 = vld [vmem:[#allocation10 + $0xe4] sm:$0xf]  ;;  %v3836_v10 = vld [vmem:[#allocation10 + $0x56c] sm:$0xf0]  ;;  %v3440_v46 = vld [vmem:[#allocation10 + $0x500] sm:$0xf] }
  0x83   :  { %2070 = vmatpush.bf16.msrb.mxu1 %v3009_v15  ;;  %v2801_v15 = vor.u32 %v3664_v0, %v2800_v62  ;;  %v3840_v62 = vld [vmem:[#allocation10 + $0x58c] sm:$0xf0]  ;;  %v2866_v0 = vld [vmem:[#allocation10 + $0x90] sm:$0xf0]  ;;  %v3694_v53 = vld [vmem:[#allocation10 + $0x104] sm:$0xf] }
  0x84   :  { %2083 = vmatpush.bf16.msrb.mxu2 %v3137_v16  ;;  %2096 = vmatpush.bf16.msrb.mxu3 %v3265_v19  ;;  %v2914_v16 = vld [vmem:[#allocation10 + $0xf0] sm:$0xf0]  ;;  %v3057_v19 = vor.u32 %v3728_v6, %v3056_v5  ;;  %v3360_v6 = vld [vmem:[#allocation10 + $0x460] sm:$0xf]  ;;  %v3832_v23 = vld [vmem:[#allocation10 + $0x54c] sm:$0xf0] }
  0x85   :  { %v2917_v30 = vor.u32 %v3690_v14, %v2914_v16  ;;  %v2978_v14 = vld [vmem:[#allocation10 + $0x170] sm:$0xf0]  ;;  %v3796_v32 = vld [vmem:[#allocation10 + $0x42c] sm:$0xf0] }
  0x86   :  { %2058 = vmatpush.bf16.msrb.mxu0 %v2865_v27  ;;  %v875_v27 = vld.sshfl [vmem:[#allocation1] sm:$0xff pattern:$0x73625140]  ;;  %v3828_v35 = vld [vmem:[#allocation10 + $0x52c] sm:$0xf0] }
  0x87   :  { %2071 = vmatpush.bf16.msrb.mxu1 %v2993_v28  ;;  %v878_v28 = vld.sshfl [vmem:[#allocation1 + $0x18] sm:$0xff pattern:$0x73625140]  ;;  %v2930_v54 = vld [vmem:[#allocation10 + $0x110] sm:$0xf0] }
  0x88   :  { %2084 = vmatpush.bf16.msrb.mxu2 %v3121_v29  ;;  %2097 = vmatpush.bf16.msrb.mxu3 %v3249_v33  ;;  %v3553_v29 = vor.u32 %v3852_v13, %v3552_v12  ;;  %v3045_v33 = vor.u32 %v3722_v18, %v3042_v20  ;;  %v2850_v12 = vld [vmem:[#allocation10 + $0x70] sm:$0xf0]  ;;  %v3706_v13 = vld [vmem:[#allocation10 + $0x164] sm:$0xf]  ;;  %v3344_v20 = vld [vmem:[#allocation10 + $0x440] sm:$0xf] }
  0x89   :  { %v2853_v18 = vor.u32 %v3674_v11, %v2850_v12  ;;  %v2981_v22 = vor.u32 %v3706_v13, %v2978_v14  ;;  %v3554_v1 = vld [vmem:[#allocation10 + $0x5f0] sm:$0xf0]  ;;  %v879_v2 = vld.sshfl [vmem:[#allocation1 + $0x20] sm:$0xff pattern:$0x73625140] }
  0x8a   :  { %2059 = vmatpush.bf16.msrb.mxu0 %v2849_v38  ;;  %v3026_v38 = vld [vmem:[#allocation10 + $0x1d0] sm:$0xf0]  ;;  %v3814_v13 = vld [vmem:[#allocation10 + $0x4c4] sm:$0xf] }
  0x8b   :  { %2072 = vmatpush.bf16.msrb.mxu1 %v2977_v39  ;;  %v4125_v39 = vpack.c.bf16 %v875_v27, %v875_v27  ;;  %v3029_v49 = vor.u32 %v3718_v37, %v3026_v38  ;;  %v2962_v27 = vld [vmem:[#allocation10 + $0x150] sm:$0xf0]  ;;  %v3698_v38 = vld [vmem:[#allocation10 + $0x124] sm:$0xf] }
  0x8c   :  { %2085 = vmatpush.bf16.msrb.mxu2 %v3105_v40  ;;  %2098 = vmatpush.bf16.msrb.mxu3 %v3233_v44  ;;  %v4127_v40 = vpack.c.bf16 %v878_v28, %v878_v28  ;;  %v3537_v44 = vor.u32 %v3848_v34, %v3536_v31  ;;  %v3328_v31 = vld [vmem:[#allocation10 + $0x420] sm:$0xf]  ;;  %v2818_v37 = vld [vmem:[#allocation10 + $0x30] sm:$0xf0] }
  0x8d   :  { %v3329_v43 = vor.u32 %v3796_v32, %v3328_v31  ;;  %v3282_v12 = vld [vmem:[#allocation10 + $0x3d0] sm:$0xf0] }
  0x8e   :  { %2060 = vmatpush.bf16.msrb.mxu0 %v2833_v50  ;;  %v3844_v50 = vld [vmem:[#allocation10 + $0x5ac] sm:$0xf0]  ;;  %v3410_v14 = vld [vmem:[#allocation10 + $0x4d0] sm:$0xf0] }
  0x8f   :  { %2073 = vmatpush.bf16.msrb.mxu1 %v2961_v51  ;;  %v3682_v51 = vld [vmem:[#allocation10 + $0xa4] sm:$0xf]  ;;  %v3522_v31 = vld [vmem:[#allocation10 + $0x5b0] sm:$0xf0] }
  0x90   :  { %2086 = vmatpush.bf16.msrb.mxu2 %v3089_v52  ;;  %2099 = vmatpush.bf16.msrb.mxu3 %v3217_v56  ;;  %v2882_v52 = vld [vmem:[#allocation10 + $0xb0] sm:$0xf0]  ;;  %v3521_v56 = vor.u32 %v3844_v50, %v3520_v48  ;;  %v2821_v48 = vor.u32 %v3666_v36, %v2818_v37  ;;  %v3662_v50 = vld [vmem:[#allocation10 + $0x4] sm:$0xf] }
  0x91   :  { %v2885_v57 = vor.u32 %v3682_v51, %v2882_v52  ;;  %v2802_v51 = vld [vmem:[#allocation10 + $0x10] sm:$0xf0]  ;;  %v3774_v37 = vld [vmem:[#allocation10 + $0x384] sm:$0xf] }
  0x92   :  { %2061 = vmatpush.bf16.msrb.mxu0 %v2817_v63  ;;  %v3678_v63 = vld [vmem:[#allocation10 + $0x84] sm:$0xf]  ;;  %v3122_v36 = vld [vmem:[#allocation10 + $0x290] sm:$0xf0] }
  0x93   :  { %2074 = vmatpush.bf16.msrb.mxu1 %v2945_v3  ;;  %v3377_v3 = vor.u32 %v3808_v59, %v3376_v58  ;;  %v2869_v5 = vor.u32 %v3678_v63, %v2866_v0  ;;  %v3298_v58 = vld [vmem:[#allocation10 + $0x3f0] sm:$0xf0]  ;;  %v2805_v0 = vor.u32 %v3662_v50, %v2802_v51  ;;  %v3738_v50 = vld [vmem:[#allocation10 + $0x264] sm:$0xf] }
  0x94   :  { %2087 = vmatpush.bf16.msrb.mxu2 %v3073_v4  ;;  %2100 = vmatpush.bf16.msrb.mxu3 %v3201_v8  ;;  %v3505_v4 = vor.u32 %v3840_v62, %v3504_v60  ;;  %v3488_v8 = vld [vmem:[#allocation10 + $0x560] sm:$0xf]  ;;  %v3818_v60 = vld [vmem:[#allocation10 + $0x4e4] sm:$0xf]  ;;  %v3106_v51 = vld [vmem:[#allocation10 + $0x270] sm:$0xf0] }
  0x95   :  { %v3489_v16 = vor.u32 %v3836_v10, %v3488_v8  ;;  %v3850_v62 = vld [vmem:[#allocation10 + $0x5e4] sm:$0xf] }
  0x96   :  { %2062 = vmatpush.bf16.msrb.mxu0 %v2801_v15  ;;  %v3361_v15 = vor.u32 %v3804_v7, %v3360_v6  ;;  %v3750_v8 = vld [vmem:[#allocation10 + $0x2c4] sm:$0xf]  ;;  %v3557_v11 = vor.u32 %v3850_v62, %v3554_v1 }
  0x97   :  { %2075 = vmatpush.bf16.msrb.mxu1 %v2929_v21  ;;  %v3800_v21 = vld [vmem:[#allocation10 + $0x44c] sm:$0xf0]  ;;  %v3782_v10 = vld [vmem:[#allocation10 + $0x3c4] sm:$0xf] }
  0x98   :  { %2088 = vmatpush.bf16.msrb.mxu2 %v3057_v19  ;;  %2101 = vmatpush.bf16.msrb.mxu3 %v3185_v26  ;;  %v3472_v19 = vld [vmem:[#allocation10 + $0x540] sm:$0xf]  ;;  %v2834_v26 = vld [vmem:[#allocation10 + $0x50] sm:$0xf0]  ;;  %v3345_v28 = vor.u32 %v3800_v21, %v3344_v20  ;;  %v3734_v62 = vld [vmem:[#allocation10 + $0x244] sm:$0xf] }
  0x99   :  { %2063 = vmatmul.bf16.vlgmr.msrb.gmra.mxu0 %v4125_v39 }
  0x9a   :  { %2107 = vmatpush.bf16.msra.mxu0 %v3425_v17  ;;  %2076 = vmatmul.bf16.vlgmr.msrb.gmra.mxu1 %v4129_v42  ;;  %v3702_v17 = vld [vmem:[#allocation10 + $0x144] sm:$0xf] }
  0x9b   :  { %2120 = vmatpush.bf16.msra.mxu1 %v3553_v29  ;;  %2089 = vmatmul.bf16.vlgmr.msrb.gmra.mxu2 %v4123_v25  ;;  %v3473_v29 = vor.u32 %v3832_v23, %v3472_v19  ;;  %v2965_v34 = vor.u32 %v3702_v17, %v2962_v27  ;;  %v3285_v19 = vor.u32 %v3782_v10, %v3282_v12  ;;  %v3746_v23 = vld [vmem:[#allocation10 + $0x2a4] sm:$0xf]  ;;  %v3266_v27 = vld [vmem:[#allocation10 + $0x3b0] sm:$0xf0] }
  0x9c   :  { %2133 = vmatpush.bf16.msra.mxu2 %v2917_v30  ;;  %2146 = vmatpush.bf16.msra.mxu3 %v3045_v33  ;;  %v2837_v30 = vor.u32 %v3670_v24, %v2834_v26  ;;  %v3456_v33 = vld [vmem:[#allocation10 + $0x520] sm:$0xf]  ;;  %v3138_v24 = vld [vmem:[#allocation10 + $0x2b0] sm:$0xf0]  ;;  %v3778_v26 = vld [vmem:[#allocation10 + $0x3a4] sm:$0xf] }
  0x9d   :  { %2102 = vmatmul.bf16.vlgmr.msrb.gmra.mxu3 %v4127_v40  ;;  %v3457_v47 = vor.u32 %v3828_v35, %v3456_v33  ;;  %v3141_v32 = vor.u32 %v3746_v23, %v3138_v24  ;;  %v3269_v33 = vor.u32 %v3778_v26, %v3266_v27  ;;  %v3742_v35 = vld [vmem:[#allocation10 + $0x284] sm:$0xf]  ;;  %v3458_v23 = vld [vmem:[#allocation10 + $0x530] sm:$0xf0] }
  0x9e   :  { %2108 = vmatpush.bf16.msra.mxu0 %v3409_v41  ;;  %v2946_v41 = vld [vmem:[#allocation10 + $0x130] sm:$0xf0]  ;;  %v3730_v12 = vld [vmem:[#allocation10 + $0x224] sm:$0xf] }
  0x9f   :  { %2121 = vmatpush.bf16.msra.mxu1 %v3537_v44  ;;  %v3312_v44 = vld [vmem:[#allocation10 + $0x400] sm:$0xf]  ;;  %v2949_v52 = vor.u32 %v3698_v38, %v2946_v41  ;;  %v3250_v41 = vld [vmem:[#allocation10 + $0x390] sm:$0xf0]  ;;  %v3726_v26 = vld [vmem:[#allocation10 + $0x204] sm:$0xf] }
  0xa0   :  { %2134 = vmatpush.bf16.msra.mxu2 %v2901_v45  ;;  %2147 = vmatpush.bf16.msra.mxu3 %v3029_v49  ;;  %v3792_v45 = vld [vmem:[#allocation10 + $0x40c] sm:$0xf0] }
  0xa1   :  { %v3824_v49 = vld [vmem:[#allocation10 + $0x50c] sm:$0xf0]  ;;  %v3313_v59 = vor.u32 %v3792_v45, %v3312_v44  ;;  %v3378_v44 = vld [vmem:[#allocation10 + $0x490] sm:$0xf0]  ;;  %v3838_v45 = vld [vmem:[#allocation10 + $0x584] sm:$0xf] }
  0xa2   :  { %2109 = vmatpush.bf16.msra.mxu0 %v3393_v55  ;;  %v3754_v55 = vld [vmem:[#allocation10 + $0x2e4] sm:$0xf]  ;;  %v3441_v63 = vor.u32 %v3824_v49, %v3440_v46  ;;  %v3506_v46 = vld [vmem:[#allocation10 + $0x590] sm:$0xf0] }
  0xa3   :  { %2122 = vmatpush.bf16.msra.mxu1 %v3521_v56  ;;  %v3170_v56 = vld [vmem:[#allocation10 + $0x2f0] sm:$0xf0] }
  0xa4   :  { %2135 = vmatpush.bf16.msra.mxu2 %v2885_v57  ;;  %2148 = vmatpush.bf16.msra.mxu3 %v3013_v61  ;;  %v3786_v57 = vld [vmem:[#allocation10 + $0x3e4] sm:$0xf]  ;;  %v3426_v61 = vld [vmem:[#allocation10 + $0x4f0] sm:$0xf0] }
  0xa5   :  { %v3301_v6 = vor.u32 %v3786_v57, %v3298_v58  ;;  %v3429_v7 = vor.u32 %v3818_v60, %v3426_v61  ;;  %v3834_v57 = vld [vmem:[#allocation10 + $0x564] sm:$0xf]  ;;  %v3490_v58 = vld [vmem:[#allocation10 + $0x570] sm:$0xf0] }
  0xa6   :  { %2110 = vmatpush.bf16.msra.mxu0 %v3377_v3  ;;  %v2933_v3 = vor.u32 %v3694_v53, %v2930_v54  ;;  %v3509_v53 = vor.u32 %v3838_v45, %v3506_v46  ;;  %v3234_v54 = vld [vmem:[#allocation10 + $0x370] sm:$0xf0]  ;;  %v3493_v1 = vor.u32 %v3834_v57, %v3490_v58  ;;  %v3725_v46 = vld [vmem:[#allocation10 + $0x1f4] sm:$0xf0]  ;;  %v2904_v58 = vld [vmem:[#allocation10 + $0xc8] sm:$0xf] }
  0xa7   :  { %2123 = vmatpush.bf16.msra.mxu1 %v3505_v4  ;;  %v3173_v4 = vor.u32 %v3754_v55, %v3170_v56  ;;  %v3802_v55 = vld [vmem:[#allocation10 + $0x464] sm:$0xf]  ;;  %v3362_v56 = vld [vmem:[#allocation10 + $0x470] sm:$0xf0] }
  0xa8   :  { %2136 = vmatpush.bf16.msra.mxu2 %v2869_v5  ;;  %2149 = vmatpush.bf16.msra.mxu3 %v2997_v9  ;;  %v880_v5 = vld.sshfl [vmem:[#allocation1 + $0x28] sm:$0xff pattern:$0x73625140]  ;;  %v3154_v9 = vld [vmem:[#allocation10 + $0x2d0] sm:$0xf0]  ;;  %v3365_v61 = vor.u32 %v3802_v55, %v3362_v56 }
  0xa9   :  { %v4137_v20 = vpack.c.bf16 %v880_v5, %v880_v5  ;;  %v3157_v21 = vor.u32 %v3750_v8, %v3154_v9  ;;  %v3830_v5 = vld [vmem:[#allocation10 + $0x544] sm:$0xf] }
  0xaa   :  { %2111 = vmatpush.bf16.msra.mxu0 %v3361_v15  ;;  %v4135_v15 = vpack.c.bf16 %v879_v2, %v879_v2  ;;  %v3218_v2 = vld [vmem:[#allocation10 + $0x350] sm:$0xf0] }
  0xab   :  { %2124 = vmatpush.bf16.msra.mxu1 %v3489_v16  ;;  %v3846_v16 = vld [vmem:[#allocation10 + $0x5c4] sm:$0xf] }
  0xac   :  { %2137 = vmatpush.bf16.msra.mxu2 %v2853_v18  ;;  %2150 = vmatpush.bf16.msra.mxu3 %v2981_v22  ;;  %v3538_v18 = vld [vmem:[#allocation10 + $0x5d0] sm:$0xf0]  ;;  %v3413_v22 = vor.u32 %v3814_v13, %v3410_v14  ;;  %v3762_v14 = vld [vmem:[#allocation10 + $0x324] sm:$0xf] }
  0xad   :  { %v3541_v17 = vor.u32 %v3846_v16, %v3538_v18  ;;  %v3074_v13 = vld [vmem:[#allocation10 + $0x230] sm:$0xf0] }
  0xae   :  { %2112 = vmatpush.bf16.msra.mxu0 %v3345_v28  ;;  %v3810_v28 = vld [vmem:[#allocation10 + $0x4a4] sm:$0xf]  ;;  %v3202_v18 = vld [vmem:[#allocation10 + $0x330] sm:$0xf0]  ;;  %v3077_v24 = vor.u32 %v3730_v12, %v3074_v13 }
  0xaf   :  { %2125 = vmatpush.bf16.msra.mxu1 %v3473_v29  ;;  %v3394_v29 = vld [vmem:[#allocation10 + $0x4b0] sm:$0xf0]  ;;  %v3205_v27 = vor.u32 %v3762_v14, %v3202_v18  ;;  %v3717_v14 = vld [vmem:[#allocation10 + $0x1b4] sm:$0xf0] }
  0xb0   :  { %2138 = vmatpush.bf16.msra.mxu2 %v2837_v30  ;;  %2151 = vmatpush.bf16.msra.mxu3 %v2965_v34  ;;  %v3842_v30 = vld [vmem:[#allocation10 + $0x5a4] sm:$0xf]  ;;  %v3397_v34 = vor.u32 %v3810_v28, %v3394_v29  ;;  %v3749_v18 = vld [vmem:[#allocation10 + $0x2b4] sm:$0xf0] }
  0xb1   :  { %v3525_v38 = vor.u32 %v3842_v30, %v3522_v31  ;;  %v3758_v29 = vld [vmem:[#allocation10 + $0x304] sm:$0xf]  ;;  %v3186_v30 = vld [vmem:[#allocation10 + $0x310] sm:$0xf0] }
  0xb2   :  { %2113 = vmatpush.bf16.msra.mxu0 %v3329_v43  ;;  %v3806_v43 = vld [vmem:[#allocation10 + $0x484] sm:$0xf] }
  0xb3   :  { %2126 = vmatpush.bf16.msra.mxu1 %v3457_v47  ;;  %v3125_v47 = vor.u32 %v3742_v35, %v3122_v36  ;;  %v3381_v49 = vor.u32 %v3806_v43, %v3378_v44  ;;  %v3790_v31 = vld [vmem:[#allocation10 + $0x404] sm:$0xf]  ;;  %v3442_v35 = vld [vmem:[#allocation10 + $0x510] sm:$0xf0] }
  0xb4   :  { %2139 = vmatpush.bf16.msra.mxu2 %v2821_v48  ;;  %2152 = vmatpush.bf16.msra.mxu3 %v2949_v52  ;;  %v3253_v48 = vor.u32 %v3774_v37, %v3250_v41  ;;  %v3770_v52 = vld [vmem:[#allocation10 + $0x364] sm:$0xf]  ;;  %v2920_v37 = vld [vmem:[#allocation10 + $0xe8] sm:$0xf] }
  0xb5   :  { %v3237_v60 = vor.u32 %v3770_v52, %v3234_v54  ;;  %v3048_v41 = vld [vmem:[#allocation10 + $0x1e8] sm:$0xf] }
  0xb6   :  { %2114 = vmatpush.bf16.msra.mxu0 %v3313_v59  ;;  %v3109_v59 = vor.u32 %v3738_v50, %v3106_v51  ;;  %v3189_v50 = vor.u32 %v3758_v29, %v3186_v30  ;;  %v3304_v52 = vld [vmem:[#allocation10 + $0x3e8] sm:$0xf]  ;;  %v3049_v56 = vor.u32 %v3725_v46, %v3048_v41  ;;  %v3713_v29 = vld [vmem:[#allocation10 + $0x194] sm:$0xf0] }
  0xb7   :  { %2127 = vmatpush.bf16.msra.mxu1 %v3441_v63  ;;  %v3090_v63 = vld [vmem:[#allocation10 + $0x250] sm:$0xf0]  ;;  %v3128_v30 = vld [vmem:[#allocation10 + $0x288] sm:$0xf] }
  0xb8   :  { %2140 = vmatpush.bf16.msra.mxu2 %v2805_v0  ;;  %2153 = vmatpush.bf16.msra.mxu3 %v2933_v3  ;;  %v3766_v0 = vld [vmem:[#allocation10 + $0x344] sm:$0xf]  ;;  %v3093_v8 = vor.u32 %v3734_v62, %v3090_v63  ;;  %v3721_v62 = vld [vmem:[#allocation10 + $0x1d4] sm:$0xf0]  ;;  %v3160_v63 = vld [vmem:[#allocation10 + $0x2c8] sm:$0xf] }
  0xb9   :  { %2115 = vmatmul.bf16.vlgmr.msra.gmra.mxu0 %v4135_v15  ;;  %v3798_v3 = vld [vmem:[#allocation10 + $0x444] sm:$0xf]  ;;  %v3221_v10 = vor.u32 %v3766_v0, %v3218_v2  ;;  %v3753_v0 = vld [vmem:[#allocation10 + $0x2d4] sm:$0xf0]  ;;  %v2984_v46 = vld [vmem:[#allocation10 + $0x168] sm:$0xf] }
  0xba   :  { %2159 = vmatpush.bf16.msrb.mxu0 %v3173_v4  ;;  %2128 = vmatmul.bf16.vlgmr.msra.gmra.mxu1 %v4137_v20  ;;  %v3346_v4 = vld [vmem:[#allocation10 + $0x450] sm:$0xf0]  ;;  %v3785_v2 = vld [vmem:[#allocation10 + $0x3d4] sm:$0xf0] }
  0xbb   :  { %2172 = vmatpush.bf16.msrb.mxu1 %v3301_v6  ;;  %2141 = vmatmul.bf16.vlgmr.msra.gmra.mxu2 %v4125_v39  ;;  %v3474_v6 = vld [vmem:[#allocation10 + $0x550] sm:$0xf0]  ;;  %v4145_v9 = vpop.f32.mrf.mxu1 }
  0xbc   :  { %2185 = vmatpush.bf16.msrb.mxu2 %v3429_v7  ;;  %2198 = vmatpush.bf16.msrb.mxu3 %v3557_v11  ;;  %v4143_v7 = vpop.f32.mrf.mxu0  ;;  %v3349_v11 = vor.u32 %v3798_v3, %v3346_v4  ;;  %v3477_v16 = vor.u32 %v3830_v5, %v3474_v6  ;;  %v3161_v6 = vor.u32 %v3753_v0, %v3160_v63  ;;  %v3224_v0 = vld [vmem:[#allocation10 + $0x348] sm:$0xf] }
  0xbd   :  { %2154 = vmatmul.bf16.vlgmr.msra.gmra.mxu3 %v4129_v42 }
  0xbe   :  { %2160 = vmatpush.bf16.msrb.mxu0 %v3157_v21  ;;  %v3794_v21 = vld [vmem:[#allocation10 + $0x424] sm:$0xf] }
  0xbf   :  { %2173 = vmatpush.bf16.msrb.mxu1 %v3285_v19  ;;  %v3330_v19 = vld [vmem:[#allocation10 + $0x430] sm:$0xf0] }
  0xc0   :  { %2186 = vmatpush.bf16.msrb.mxu2 %v3413_v22  ;;  %2199 = vmatpush.bf16.msrb.mxu3 %v3541_v17  ;;  %v3826_v22 = vld [vmem:[#allocation10 + $0x524] sm:$0xf]  ;;  %v3058_v17 = vld [vmem:[#allocation10 + $0x210] sm:$0xf0]  ;;  %v3333_v28 = vor.u32 %v3794_v21, %v3330_v19  ;;  %v3272_v21 = vld [vmem:[#allocation10 + $0x3a8] sm:$0xf] }
  0xc1   :  { %v3061_v45 = vor.u32 %v3726_v26, %v3058_v17  ;;  %v3781_v19 = vld [vmem:[#allocation10 + $0x3b4] sm:$0xf0]  ;;  %v2872_v26 = vld [vmem:[#allocation10 + $0x88] sm:$0xf] }
  0xc2   :  { %2161 = vmatpush.bf16.msrb.mxu0 %v3141_v32  ;;  %v3461_v32 = vor.u32 %v3826_v22, %v3458_v23  ;;  %v3681_v17 = vld [vmem:[#allocation10 + $0x94] sm:$0xf0] }
  0xc3   :  { %2174 = vmatpush.bf16.msrb.mxu1 %v3269_v33  ;;  %v3314_v33 = vld [vmem:[#allocation10 + $0x410] sm:$0xf0] }
  0xc4   :  { %2187 = vmatpush.bf16.msrb.mxu2 %v3397_v34  ;;  %2200 = vmatpush.bf16.msrb.mxu3 %v3525_v38  ;;  %v3822_v34 = vld [vmem:[#allocation10 + $0x504] sm:$0xf]  ;;  %v4147_v36 = vpop.f32.mrf.mxu2  ;;  %v3693_v38 = vld [vmem:[#allocation10 + $0xf4] sm:$0xf0]  ;;  %v708_v43 = vpop.f32.mrf.mxu0  ;;  %v3317_v51 = vor.u32 %v3790_v31, %v3314_v33  ;;  %v3256_v33 = vld [vmem:[#allocation10 + $0x388] sm:$0xf] }
  0xc5   :  { %v4149_v44 = vpop.f32.mrf.mxu3  ;;  %v3445_v54 = vor.u32 %v3822_v34, %v3442_v35  ;;  %v2921_v55 = vor.u32 %v3693_v38, %v2920_v37  ;;  %v3745_v31 = vld [vmem:[#allocation10 + $0x294] sm:$0xf0]  ;;  %v2873_v35 = vor.u32 %v3681_v17, %v2872_v26  ;;  %v2856_v43 = vld [vmem:[#allocation10 + $0x68] sm:$0xf] }
  0xc6   :  { %2162 = vmatpush.bf16.msrb.mxu0 %v3125_v47  ;;  %v3176_v47 = vld [vmem:[#allocation10 + $0x2e8] sm:$0xf]  ;;  %v3777_v34 = vld [vmem:[#allocation10 + $0x394] sm:$0xf0]  ;;  %v3129_v41 = vor.u32 %v3745_v31, %v3128_v30 }
  0xc7   :  { %2175 = vmatpush.bf16.msrb.mxu1 %v3253_v48  ;;  %v3757_v48 = vld [vmem:[#allocation10 + $0x2f4] sm:$0xf0] }
  0xc8   :  { %2188 = vmatpush.bf16.msrb.mxu2 %v3381_v49  ;;  %2201 = vmatpush.bf16.msrb.mxu3 %v3509_v53  ;;  %v721_v49 = vpop.f32.mrf.mxu1  ;;  %v3789_v53 = vld [vmem:[#allocation10 + $0x3f4] sm:$0xf0]  ;;  %v3177_v57 = vor.u32 %v3757_v48, %v3176_v47  ;;  %v3257_v47 = vor.u32 %v3777_v34, %v3256_v33  ;;  %v3192_v33 = vld [vmem:[#allocation10 + $0x308] sm:$0xf] }
  0xc9   :  { %v3709_v48 = vld [vmem:[#allocation10 + $0x174] sm:$0xf0]  ;;  %v3112_v49 = vld [vmem:[#allocation10 + $0x268] sm:$0xf] }
  0xca   :  { %2163 = vmatpush.bf16.msrb.mxu0 %v3109_v59  ;;  %v3689_v59 = vld [vmem:[#allocation10 + $0xd4] sm:$0xf0] }
  0xcb   :  { %2176 = vmatpush.bf16.msrb.mxu1 %v3237_v60  ;;  %v3032_v60 = vld [vmem:[#allocation10 + $0x1c8] sm:$0xf]  ;;  %v2905_v3 = vor.u32 %v3689_v59, %v2904_v58  ;;  %v3729_v31 = vld [vmem:[#allocation10 + $0x214] sm:$0xf0] }
  0xcc   :  { %2189 = vmatpush.bf16.msrb.mxu2 %v3365_v61  ;;  %2202 = vmatpush.bf16.msrb.mxu3 %v3493_v1  ;;  %v3305_v61 = vor.u32 %v3789_v53, %v3304_v52  ;;  %v3288_v1 = vld [vmem:[#allocation10 + $0x3c8] sm:$0xf]  ;;  %v734_v4 = vpop.f32.mrf.mxu2  ;;  %v3033_v5 = vor.u32 %v3721_v62, %v3032_v60  ;;  %v3773_v52 = vld [vmem:[#allocation10 + $0x374] sm:$0xf0] }
  0xcd   :  { %v747_v12 = vpop.f32.mrf.mxu3  ;;  %v3289_v13 = vor.u32 %v3785_v2, %v3288_v1  ;;  %v2968_v58 = vld [vmem:[#allocation10 + $0x148] sm:$0xf]  ;;  %v3705_v60 = vld [vmem:[#allocation10 + $0x154] sm:$0xf0] }
  0xce   :  { %2164 = vmatpush.bf16.msrb.mxu0 %v3093_v8  ;;  %v2888_v8 = vld [vmem:[#allocation10 + $0xa8] sm:$0xf]  ;;  %v3737_v62 = vld [vmem:[#allocation10 + $0x254] sm:$0xf0] }
  0xcf   :  { %2177 = vmatpush.bf16.msrb.mxu1 %v3221_v10  ;;  %v3685_v10 = vld [vmem:[#allocation10 + $0xb4] sm:$0xf0]  ;;  %v2952_v12 = vld [vmem:[#allocation10 + $0x128] sm:$0xf] }
  0xd0   :  { %2190 = vmatpush.bf16.msrb.mxu2 %v3349_v11  ;;  %2203 = vmatpush.bf16.msrb.mxu3 %v3477_v16  ;;  %v3016_v11 = vld [vmem:[#allocation10 + $0x1a8] sm:$0xf]  ;;  %v2889_v22 = vor.u32 %v3685_v10, %v2888_v8  ;;  %v3769_v1 = vld [vmem:[#allocation10 + $0x354] sm:$0xf0] }
  0xd1   :  { %v3144_v16 = vld [vmem:[#allocation10 + $0x2a8] sm:$0xf]  ;;  %v3017_v23 = vor.u32 %v3717_v14, %v3016_v11  ;;  %v3669_v11 = vld [vmem:[#allocation10 + $0x34] sm:$0xf0] }
  0xd2   :  { %2165 = vmatpush.bf16.msrb.mxu0 %v3077_v24  ;;  %v3145_v24 = vor.u32 %v3749_v18, %v3144_v16  ;;  %v2824_v10 = vld [vmem:[#allocation10 + $0x28] sm:$0xf]  ;;  %v3701_v14 = vld [vmem:[#allocation10 + $0x134] sm:$0xf0] }
  0xd3   :  { %2178 = vmatpush.bf16.msrb.mxu1 %v3205_v27  ;;  %v3000_v27 = vld [vmem:[#allocation10 + $0x188] sm:$0xf]  ;;  %v3733_v18 = vld [vmem:[#allocation10 + $0x234] sm:$0xf0]  ;;  %v2953_v26 = vor.u32 %v3701_v14, %v2952_v12 }
  0xd4   :  { %2191 = vmatpush.bf16.msrb.mxu2 %v3333_v28  ;;  %2204 = vmatpush.bf16.msrb.mxu3 %v3461_v32  ;;  %v3273_v28 = vor.u32 %v3781_v19, %v3272_v21  ;;  %v3001_v38 = vor.u32 %v3713_v29, %v3000_v27  ;;  %v3080_v16 = vld [vmem:[#allocation10 + $0x228] sm:$0xf]  ;;  %v3765_v19 = vld [vmem:[#allocation10 + $0x334] sm:$0xf0] }
  0xd5   :  { %v3208_v21 = vld [vmem:[#allocation10 + $0x328] sm:$0xf]  ;;  %v3081_v17 = vor.u32 %v3733_v18, %v3080_v16  ;;  %v3761_v34 = vld [vmem:[#allocation10 + $0x314] sm:$0xf0] }
  0xd6   :  { %2166 = vmatpush.bf16.msrb.mxu0 %v3061_v45  ;;  %v4155_v32 = vpop.f32.mrf.mxu0  ;;  %v3677_v45 = vld [vmem:[#allocation10 + $0x74] sm:$0xf0]  ;;  %v2936_v27 = vld [vmem:[#allocation10 + $0x108] sm:$0xf]  ;;  %v3209_v30 = vor.u32 %v3765_v19, %v3208_v21  ;;  %v3683_v19 = vld [vmem:[#allocation10 + $0xac] sm:$0xf] }
  0xd7   :  { %2179 = vmatpush.bf16.msrb.mxu1 %v3189_v50  ;;  %v4157_v37 = vpop.f32.mrf.mxu1  ;;  %v3741_v50 = vld [vmem:[#allocation10 + $0x274] sm:$0xf0]  ;;  %v2857_v53 = vor.u32 %v3677_v45, %v2856_v43  ;;  %v3064_v29 = vld [vmem:[#allocation10 + $0x208] sm:$0xf] }
  0xd8   :  { %2192 = vmatpush.bf16.msrb.mxu2 %v3317_v51  ;;  %2205 = vmatpush.bf16.msrb.mxu3 %v3445_v54  ;;  %v3240_v51 = vld [vmem:[#allocation10 + $0x368] sm:$0xf]  ;;  %v2985_v54 = vor.u32 %v3709_v48, %v2984_v46  ;;  %v3691_v48 = vld [vmem:[#allocation10 + $0xec] sm:$0xf]  ;;  %v3813_v14 = vld [vmem:[#allocation10 + $0x4b4] sm:$0xf0] }
  0xd9   :  { %2167 = vmatmul.bf16.vlgmr.msrb.gmra.mxu0 %v4123_v25  ;;  %v3241_v59 = vor.u32 %v3773_v52, %v3240_v51  ;;  %v3560_v43 = vld [vmem:[#allocation10 + $0x5e8] sm:$0xf]  ;;  %v3065_v51 = vor.u32 %v3729_v31, %v3064_v29  ;;  %v3723_v52 = vld [vmem:[#allocation10 + $0x1ec] sm:$0xf]  ;;  %v3845_v21 = vld [vmem:[#allocation10 + $0x5b4] sm:$0xf0] }
  0xda   :  { %2211 = vmatpush.bf16.msra.mxu0 %v2921_v55  ;;  %2180 = vmatmul.bf16.vlgmr.msrb.gmra.mxu1 %v4127_v40  ;;  %v3113_v55 = vor.u32 %v3741_v50, %v3112_v49  ;;  %v2922_v49 = vld [vmem:[#allocation10 + $0xf8] sm:$0xf0]  ;;  %v3528_v16 = vld [vmem:[#allocation10 + $0x5a8] sm:$0xf] }
  0xdb   :  { %2224 = vmatpush.bf16.msra.mxu1 %v3049_v56  ;;  %2193 = vmatmul.bf16.vlgmr.msrb.gmra.mxu2 %v4135_v15  ;;  %v2840_v56 = vld [vmem:[#allocation10 + $0x48] sm:$0xf] }
  0xdc   :  { %2237 = vmatpush.bf16.msra.mxu2 %v3177_v57  ;;  %2250 = vmatpush.bf16.msra.mxu3 %v3305_v61  ;;  %v3673_v57 = vld [vmem:[#allocation10 + $0x54] sm:$0xf0]  ;;  %v3096_v61 = vld [vmem:[#allocation10 + $0x248] sm:$0xf] }
  0xdd   :  { %2206 = vmatmul.bf16.vlgmr.msrb.gmra.mxu3 %v4137_v20  ;;  %v2841_v4 = vor.u32 %v3673_v57, %v2840_v56  ;;  %v3097_v8 = vor.u32 %v3737_v62, %v3096_v61  ;;  %v3544_v61 = vld [vmem:[#allocation10 + $0x5c8] sm:$0xf] }
  0xde   :  { %2212 = vmatpush.bf16.msra.mxu0 %v2905_v3  ;;  %v4159_v63 = vpop.f32.mrf.mxu2  ;;  %v760_v3 = vpop.f32.mrf.mxu0  ;;  %v3384_v29 = vld [vmem:[#allocation10 + $0x488] sm:$0xf] }
  0xdf   :  { %2225 = vmatpush.bf16.msra.mxu1 %v3033_v5  ;;  %v773_v5 = vpop.f32.mrf.mxu1  ;;  %v2906_v3 = vld [vmem:[#allocation10 + $0xd8] sm:$0xf0] }
  0xe0   :  { %2238 = vmatpush.bf16.msra.mxu2 %v3161_v6  ;;  %2251 = vmatpush.bf16.msra.mxu3 %v3289_v13  ;;  %v4161_v2 = vpop.f32.mrf.mxu3  ;;  %v2969_v6 = vor.u32 %v3705_v60, %v2968_v58  ;;  %v3225_v13 = vor.u32 %v3769_v1, %v3224_v0  ;;  %v2925_v58 = vor.u32 %v3691_v48, %v2922_v49  ;;  %v3817_v60 = vld [vmem:[#allocation10 + $0x4d4] sm:$0xf0]  ;;  %v3687_v1 = vld [vmem:[#allocation10 + $0xcc] sm:$0xf] }
  0xe1   :  { %v3849_v0 = vld [vmem:[#allocation10 + $0x5d4] sm:$0xf0]  ;;  %v3719_v5 = vld [vmem:[#allocation10 + $0x1cc] sm:$0xf]  ;;  %v2909_v12 = vor.u32 %v3687_v1, %v2906_v3 }
  0xe2   :  { %2213 = vmatpush.bf16.msra.mxu0 %v2889_v22  ;;  %v2825_v22 = vor.u32 %v3669_v11, %v2824_v10  ;;  %v3545_v11 = vor.u32 %v3849_v0, %v3544_v61  ;;  %v2986_v61 = vld [vmem:[#allocation10 + $0x178] sm:$0xf0] }
  0xe3   :  { %2226 = vmatpush.bf16.msra.mxu1 %v3017_v23  ;;  %v2808_v23 = vld [vmem:[#allocation10 + $0x8] sm:$0xf] }
  0xe4   :  { %2239 = vmatpush.bf16.msra.mxu2 %v3145_v24  ;;  %2252 = vmatpush.bf16.msra.mxu3 %v3273_v28  ;;  %v3665_v24 = vld [vmem:[#allocation10 + $0x14] sm:$0xf0] }
  0xe5   :  { %v3697_v28 = vld [vmem:[#allocation10 + $0x114] sm:$0xf0]  ;;  %v2809_v46 = vor.u32 %v3665_v24, %v2808_v23 }
  0xe6   :  { %2214 = vmatpush.bf16.msra.mxu0 %v2873_v35  ;;  %v786_v35 = vpop.f32.mrf.mxu2  ;;  %v2937_v50 = vor.u32 %v3697_v28, %v2936_v27 }
  0xe7   :  { %2227 = vmatpush.bf16.msra.mxu1 %v3001_v38  ;;  %v3432_v38 = vld [vmem:[#allocation10 + $0x4e8] sm:$0xf] }
  0xe8   :  { %2240 = vmatpush.bf16.msra.mxu2 %v3129_v41  ;;  %2253 = vmatpush.bf16.msra.mxu3 %v3257_v47  ;;  %v3821_v41 = vld [vmem:[#allocation10 + $0x4f4] sm:$0xf0]  ;;  %v799_v45 = vpop.f32.mrf.mxu3 }
  0xe9   :  { %v3853_v47 = vld [vmem:[#allocation10 + $0x5f4] sm:$0xf0]  ;;  %v3433_v56 = vor.u32 %v3821_v41, %v3432_v38  ;;  %v3679_v38 = vld [vmem:[#allocation10 + $0x8c] sm:$0xf]  ;;  %v2874_v41 = vld [vmem:[#allocation10 + $0x98] sm:$0xf0] }
  0xea   :  { %2215 = vmatpush.bf16.msra.mxu0 %v2857_v53  ;;  %v3050_v53 = vld [vmem:[#allocation10 + $0x1f8] sm:$0xf0]  ;;  %v3561_v57 = vor.u32 %v3853_v47, %v3560_v43 }
  0xeb   :  { %2228 = vmatpush.bf16.msra.mxu1 %v2985_v54  ;;  %v4163_v54 = vld [vmem:[#allocation7] sm:$0xf]  ;;  %v3053_v62 = vor.u32 %v3723_v52, %v3050_v53  ;;  %v3002_v47 = vld [vmem:[#allocation10 + $0x198] sm:$0xf0]  ;;  %v2877_v52 = vor.u32 %v3679_v38, %v2874_v41  ;;  %v3368_v53 = vld [vmem:[#allocation10 + $0x468] sm:$0xf] }
  0xec   :  { %2241 = vmatpush.bf16.msra.mxu2 %v3113_v55  ;;  %2254 = vmatpush.bf16.msra.mxu3 %v3241_v59  ;;  %v3193_v55 = vor.u32 %v3761_v34, %v3192_v33  ;;  %v3416_v59 = vld [vmem:[#allocation10 + $0x4c8] sm:$0xf]  ;;  %v209_v23 = vperm.slane %v4163_v54, 0  ;;  %v3809_v33 = vld [vmem:[#allocation10 + $0x494] sm:$0xf0]  ;;  %v212_v43 = vperm.slane %v4163_v54, 3 }
  0xed   :  { %v3417_v10 = vor.u32 %v3817_v60, %v3416_v59  ;;  %v3512_v34 = vld [vmem:[#allocation10 + $0x588] sm:$0xf]  ;;  %v3385_v49 = vor.u32 %v3809_v33, %v3384_v29  ;;  %v3707_v60 = vld [vmem:[#allocation10 + $0x16c] sm:$0xf]  ;;  %v3797_v29 = vld [vmem:[#allocation10 + $0x434] sm:$0xf0] }
  0xee   :  { %2216 = vmatpush.bf16.msra.mxu0 %v2841_v4  ;;  %v210_v4 = vperm.slane %v4163_v54, 1  ;;  %v2954_v38 = vld [vmem:[#allocation10 + $0x138] sm:$0xf0] }
  0xef   :  { %2229 = vmatpush.bf16.msra.mxu1 %v2969_v6  ;;  %v3034_v6 = vld [vmem:[#allocation10 + $0x1d8] sm:$0xf0] }
  0xf0   :  { %2242 = vmatpush.bf16.msra.mxu2 %v3097_v8  ;;  %2255 = vmatpush.bf16.msra.mxu3 %v3225_v13  ;;  %v211_v8 = vperm.slane %v4163_v54, 2  ;;  %v3400_v13 = vld [vmem:[#allocation10 + $0x4a8] sm:$0xf]  ;;  %v3037_v18 = vor.u32 %v3719_v5, %v3034_v6  ;;  %v746_v24 = vadd.f32 %v4149_v44, %v210_v4  ;;  %v3841_v44 = vld [vmem:[#allocation10 + $0x594] sm:$0xf0] }
  0xf1   :  { %v3401_v28 = vor.u32 %v3813_v14, %v3400_v13  ;;  %v3352_v6 = vld [vmem:[#allocation10 + $0x448] sm:$0xf]  ;;  %v3833_v13 = vld [vmem:[#allocation10 + $0x554] sm:$0xf0]  ;;  %v2842_v14 = vld [vmem:[#allocation10 + $0x58] sm:$0xf0] }
  0xf2   :  { %2217 = vmatpush.bf16.msra.mxu0 %v2825_v22  ;;  %v2890_v22 = vld [vmem:[#allocation10 + $0xb8] sm:$0xf0]  ;;  %v785_v27 = vadd.f32 %v4159_v63, %v211_v8  ;;  %v707_v63 = vadd.f32 %v4143_v7, %v209_v23  ;;  %v759_v45 = vadd.f32 %v4155_v32, %v746_v24  ;;  %v3837_v7 = vld [vmem:[#allocation10 + $0x574] sm:$0xf0] }
  0xf3   :  { %2230 = vmatpush.bf16.msra.mxu1 %v2953_v26  ;;  %v3715_v26 = vld [vmem:[#allocation10 + $0x1ac] sm:$0xf]  ;;  %v2893_v31 = vor.u32 %v3683_v19, %v2890_v22  ;;  %v2858_v32 = vld [vmem:[#allocation10 + $0x78] sm:$0xf0]  ;;  %v3801_v8 = vld [vmem:[#allocation10 + $0x454] sm:$0xf0] }
  0xf4   :  { %2243 = vmatpush.bf16.msra.mxu2 %v3081_v17  ;;  %2256 = vmatpush.bf16.msra.mxu3 %v3209_v30  ;;  %v3018_v17 = vld [vmem:[#allocation10 + $0x1b8] sm:$0xf0]  ;;  %v3529_v30 = vor.u32 %v3845_v21, %v3528_v16  ;;  %v798_v48 = vadd.f32 %v4161_v2, %v785_v27  ;;  %v720_v59 = vadd.f32 %v4145_v9, %v707_v63  ;;  %v3703_v21 = vld [vmem:[#allocation10 + $0x14c] sm:$0xf] }
  0xf5   :  { %v3021_v35 = vor.u32 %v3715_v26, %v3018_v17  ;;  %v772_v2 = vadd.f32 %v4157_v37, %v759_v45  ;;  %v3671_v37 = vld [vmem:[#allocation10 + $0x4c] sm:$0xf]  ;;  %v2970_v19 = vld [vmem:[#allocation10 + $0x158] sm:$0xf0]  ;;  %v3353_v24 = vor.u32 %v3801_v8, %v3352_v6  ;;  %v3336_v26 = vld [vmem:[#allocation10 + $0x428] sm:$0xf] }
  0xf6   :  { %2218 = vmatpush.bf16.msra.mxu0 %v2809_v46  ;;  %v3711_v46 = vld [vmem:[#allocation10 + $0x18c] sm:$0xf]  ;;  %v733_v16 = vadd.f32 %v4147_v36, %v720_v59  ;;  %v2973_v33 = vor.u32 %v3703_v21, %v2970_v19  ;;  %v3337_v45 = vor.u32 %v3797_v29, %v3336_v26  ;;  %v3178_v59 = vld [vmem:[#allocation10 + $0x2f8] sm:$0xf0] }
  0xf7   :  { %2231 = vmatpush.bf16.msra.mxu1 %v2937_v50  ;;  %v823_v50 = vpop.f32.mrf.mxu1  ;;  %v3005_v54 = vor.u32 %v3711_v46, %v3002_v47  ;;  %v3320_v46 = vld [vmem:[#allocation10 + $0x408] sm:$0xf]  ;;  %v3793_v47 = vld [vmem:[#allocation10 + $0x414] sm:$0xf0]  ;;  %v3847_v21 = vld [vmem:[#allocation10 + $0x5cc] sm:$0xf] }
  0xf8   :  { %2244 = vmatpush.bf16.msra.mxu2 %v3065_v51  ;;  %2257 = vmatpush.bf16.msra.mxu3 %v3193_v55  ;;  %v3513_v51 = vor.u32 %v3841_v44, %v3512_v34  ;;  %v3805_v55 = vld [vmem:[#allocation10 + $0x474] sm:$0xf0]  ;;  %v3667_v34 = vld [vmem:[#allocation10 + $0x2c] sm:$0xf]  ;;  %v2826_v44 = vld [vmem:[#allocation10 + $0x38] sm:$0xf0] }
  0xf9   :  { %2219 = vmatmul.bf16.vlgmr.msra.gmra.mxu0 %v4125_v39  ;;  %v3369_v0 = vor.u32 %v3805_v55, %v3368_v53  ;;  %v2810_v53 = vld [vmem:[#allocation10 + $0x18] sm:$0xf0] }
  0xfa   :  { %2263 = vmatpush.bf16.msrb.mxu0 %v3433_v56  ;;  %2232 = vmatmul.bf16.vlgmr.msra.gmra.mxu1 %v4129_v42  ;;  %v3496_v56 = vld [vmem:[#allocation10 + $0x568] sm:$0xf]  ;;  %v3546_v19 = vld [vmem:[#allocation10 + $0x5d8] sm:$0xf0] }
  0xfb   :  { %2276 = vmatpush.bf16.msrb.mxu1 %v3561_v57  ;;  %2245 = vmatmul.bf16.vlgmr.msra.gmra.mxu2 %v4123_v25  ;;  %v824_v57 = vadd.f32 %v823_v50, %v212_v43  ;;  %v3497_v3 = vor.u32 %v3837_v7, %v3496_v56  ;;  %v2829_v50 = vor.u32 %v3667_v34, %v2826_v44  ;;  %v2938_v7 = vld [vmem:[#allocation10 + $0x118] sm:$0xf0] }
  0xfc   :  { %2289 = vmatpush.bf16.msrb.mxu2 %v2925_v58  ;;  %2302 = vmatpush.bf16.msrb.mxu3 %v3053_v62  ;;  %v3675_v58 = vld [vmem:[#allocation10 + $0x6c] sm:$0xf]  ;;  %v810_v62 = vpop.f32.mrf.mxu0  ;;  %v3549_v29 = vor.u32 %v3847_v21, %v3546_v19  ;;  %v3530_v34 = vld [vmem:[#allocation10 + $0x5b8] sm:$0xf0] }
  0xfd   :  { %2258 = vmatmul.bf16.vlgmr.msra.gmra.mxu3 %v4127_v40  ;;  %v811_v1 = vadd.f32 %v810_v62, %v798_v48  ;;  %v2861_v4 = vor.u32 %v3675_v58, %v2858_v32  ;;  %v3448_v48 = vld [vmem:[#allocation10 + $0x508] sm:$0xf]  ;;  %v3755_v58 = vld [vmem:[#allocation10 + $0x2ec] sm:$0xf] }
  0xfe   :  { %2264 = vmatpush.bf16.msrb.mxu0 %v3417_v10  ;;  %v836_v5 = vpop.f32.mrf.mxu2  ;;  %v3480_v10 = vld [vmem:[#allocation10 + $0x548] sm:$0xf]  ;;  %v3819_v62 = vld [vmem:[#allocation10 + $0x4ec] sm:$0xf]  ;;  %v3181_v8 = vor.u32 %v3755_v58, %v3178_v59 }
  0xff   :  { %2277 = vmatpush.bf16.msrb.mxu1 %v3545_v11  ;;  %v2989_v11 = vor.u32 %v3707_v60, %v2986_v61  ;;  %v858_v22 = vrot.slane %v811_v1, 4  ;;  %v825_v17 = vpop.f32.mrf.mxu1  ;;  %v3481_v27 = vor.u32 %v3833_v13, %v3480_v10  ;;  %v3321_v60 = vor.u32 %v3793_v47, %v3320_v46  ;;  %v3306_v61 = vld [vmem:[#allocation10 + $0x3f8] sm:$0xf0]  ;;  %v3783_v13 = vld [vmem:[#allocation10 + $0x3cc] sm:$0xf] }
 0x100   :  { %2290 = vmatpush.bf16.msrb.mxu2 %v2909_v12  ;;  %2303 = vmatpush.bf16.msrb.mxu3 %v3037_v18  ;;  %v837_v12 = vadd.f32 %v836_v5, %v824_v57  ;;  %v849_v9 = vpop.f32.mrf.mxu3  ;;  %v857_v18 = vrot.slane %v772_v2, 6  ;;  %v3695_v57 = vld [vmem:[#allocation10 + $0x10c] sm:$0xf]  ;;  %v3562_v5 = vld [vmem:[#allocation10 + $0x5f8] sm:$0xf0] }
 0x101   :  { %v3787_v2 = vld [vmem:[#allocation10 + $0x3ec] sm:$0xf]  ;;  %v2941_v6 = vor.u32 %v3695_v57, %v2938_v7  ;;  %v3146_v17 = vld [vmem:[#allocation10 + $0x2b8] sm:$0xf0] }
 0x102   :  { %2265 = vmatpush.bf16.msrb.mxu0 %v3401_v28  ;;  %v850_v23 = vadd.f32 %v849_v9, %v837_v12  ;;  %v2845_v28 = vor.u32 %v3671_v37, %v2842_v14  ;;  %v861_v43 = vsel %vm860_vm0, %v733_v16, %v857_v18  ;;  %v3309_v10 = vor.u32 %v3787_v2, %v3306_v61  ;;  %v3751_v12 = vld [vmem:[#allocation10 + $0x2cc] sm:$0xf]  ;;  %v3162_v9 = vld [vmem:[#allocation10 + $0x2d8] sm:$0xf0] }
 0x103   :  { %2278 = vmatpush.bf16.msrb.mxu1 %v3529_v30  ;;  %v3464_v30 = vld [vmem:[#allocation10 + $0x528] sm:$0xf]  ;;  %v3290_v14 = vld [vmem:[#allocation10 + $0x3d8] sm:$0xf0]  ;;  %v3815_v16 = vld [vmem:[#allocation10 + $0x4cc] sm:$0xf] }
 0x104   :  { %2291 = vmatpush.bf16.msrb.mxu2 %v2893_v31  ;;  %2304 = vmatpush.bf16.msrb.mxu3 %v3021_v35  ;;  %v3829_v31 = vld [vmem:[#allocation10 + $0x534] sm:$0xf0]  ;;  %v859_v36 = vrot.slane %v850_v23, 2  ;;  %v3699_v35 = vld [vmem:[#allocation10 + $0x12c] sm:$0xf]  ;;  %v812_v41 = vpop.f32.mrf.mxu0 }
 0x105   :  { %v3418_v18 = vld [vmem:[#allocation10 + $0x4d8] sm:$0xf0]  ;;  %v3747_v23 = vld [vmem:[#allocation10 + $0x2ac] sm:$0xf] }
 0x106   :  { %2266 = vmatpush.bf16.msrb.mxu0 %v3385_v49  ;;  %v863_v63 = vsel %vm862_vm1, %v858_v22, %v859_v36  ;;  %v3465_v49 = vor.u32 %v3829_v31, %v3464_v30  ;;  %v838_v55 = vpop.f32.mrf.mxu2  ;;  %v3165_v22 = vor.u32 %v3751_v12, %v3162_v9  ;;  %v3421_v26 = vor.u32 %v3815_v16, %v3418_v18  ;;  %v3811_v30 = vld [vmem:[#allocation10 + $0x4ac] sm:$0xf]  ;;  %v3402_v31 = vld [vmem:[#allocation10 + $0x4b8] sm:$0xf0]  ;;  %v4188_v36 = vld [vmem:[%s4215_s5] sm:$0xf] }
 0x107   :  { %2279 = vmatpush.bf16.msrb.mxu1 %v3513_v51  ;;  %v3825_v51 = vld [vmem:[#allocation10 + $0x514] sm:$0xf0]  ;;  %v865_v56 = vsel %vm864_vm2, %v861_v43, %v863_v63  ;;  %v3149_v44 = vor.u32 %v3747_v23, %v3146_v17  ;;  %v3130_v41 = vld [vmem:[#allocation10 + $0x298] sm:$0xf0]  ;;  %v3775_v43 = vld [vmem:[#allocation10 + $0x38c] sm:$0xf] }
 0x108   :  { %2292 = vmatpush.bf16.msrb.mxu2 %v2877_v52  ;;  %2305 = vmatpush.bf16.msrb.mxu3 %v3005_v54  ;;  %v3663_v52 = vld [vmem:[#allocation10 + $0xc] sm:$0xf]  ;;  %v2957_v54 = vor.u32 %v3699_v35, %v2954_v38  ;;  %v851_v32 = vpop.f32.mrf.mxu3  ;;  %867 = vst [vmem:[#allocation11] sm:$0xff] %v865_v56  ;;  %v3449_v1 = vor.u32 %v3825_v51, %v3448_v48  ;;  %v1087_v63 = vperm.slane %v4188_v36, 0  ;;  %v3258_v46 = vld [vmem:[#allocation10 + $0x398] sm:$0xf0] }
 0x109   :  { %v3743_v35 = vld [vmem:[#allocation10 + $0x28c] sm:$0xf]  ;;  %v3405_v38 = vor.u32 %v3811_v30, %v3402_v31  ;;  %v3386_v48 = vld [vmem:[#allocation10 + $0x498] sm:$0xf0]  ;;  %s4048_s5 = smov [#allocation11]  }
 0x10a   :  { %2267 = vmatpush.bf16.msrb.mxu0 %v3369_v0  ;;  %v3434_v0 = vld [vmem:[#allocation10 + $0x4f8] sm:$0xf0]  ;;  %v3807_v47 = vld [vmem:[#allocation10 + $0x48c] sm:$0xf]  ;;  %s2384_s25 = sshll.u32 %s4048_s5, 4  ;;  %s2385_s25 = int_to_ptr.vmem [resolvable:$true] %s2384_s25 }
 0x10b   :  { %2280 = vmatpush.bf16.msrb.mxu1 %v3497_v3  ;;  %v2813_v3 = vor.u32 %v3663_v52, %v2810_v53  ;;  %v3261_v52 = vor.u32 %v3775_v43, %v3258_v46  ;;  %v3389_v53 = vor.u32 %v3807_v47, %v3386_v48  ;;  %v3739_v55 = vld [vmem:[#allocation10 + $0x26c] sm:$0xf]  ;;  %v3114_v56 = vld [vmem:[#allocation10 + $0x278] sm:$0xf0]  ;;  %2389 = dma.vmem_to_hbm [thread:$0]  %s2385_s25, 128, %s2387_s28, [#allocation4]  }
 0x10c   :  { %2293 = vmatpush.bf16.msrb.mxu2 %v2861_v4  ;;  %2306 = vmatpush.bf16.msrb.mxu3 %v2989_v11  ;;  %v3851_v4 = vld [vmem:[#allocation10 + $0x5ec] sm:$0xf]  ;;  %v3437_v11 = vor.u32 %v3819_v62, %v3434_v0  ;;  %v3242_v32 = vld [vmem:[#allocation10 + $0x378] sm:$0xf0]  ;;  %v3117_v0 = vor.u32 %v3739_v55, %v3114_v56 }
 0x10d   :  { %v3565_v37 = vor.u32 %v3851_v4, %v3562_v5  ;;  %v3803_v59 = vld [vmem:[#allocation10 + $0x46c] sm:$0xf]  ;;  %v3370_v2 = vld [vmem:[#allocation10 + $0x478] sm:$0xf0] }
 0x10e   :  { %2268 = vmatpush.bf16.msrb.mxu0 %v3353_v24  ;;  %v3293_v24 = vor.u32 %v3783_v13, %v3290_v14  ;;  %v3498_v61 = vld [vmem:[#allocation10 + $0x578] sm:$0xf0]  ;;  %v3735_v4 = vld [vmem:[#allocation10 + $0x24c] sm:$0xf] }
 0x10f   :  { %2281 = vmatpush.bf16.msrb.mxu1 %v3481_v27  ;;  %v3779_v27 = vld [vmem:[#allocation10 + $0x3ac] sm:$0xf]  ;;  %v3098_v5 = vld [vmem:[#allocation10 + $0x258] sm:$0xf0] }
 0x110   :  { %2294 = vmatpush.bf16.msrb.mxu2 %v2845_v28  ;;  %2307 = vmatpush.bf16.msrb.mxu3 %v2973_v33  ;;  %v3274_v28 = vld [vmem:[#allocation10 + $0x3b8] sm:$0xf0]  ;;  %v3843_v33 = vld [vmem:[#allocation10 + $0x5ac] sm:$0xf]  ;;  %v3101_v18 = vor.u32 %v3735_v4, %v3098_v5 }
 0x111   :  { %v3799_v12 = vld [vmem:[#allocation10 + $0x44c] sm:$0xf]  ;;  %v3354_v9 = vld [vmem:[#allocation10 + $0x458] sm:$0xf0] }
 0x112   :  { %2269 = vmatpush.bf16.msrb.mxu0 %v3337_v45  ;;  %v3533_v45 = vor.u32 %v3843_v33, %v3530_v34  ;;  %v3831_v14 = vld [vmem:[#allocation10 + $0x54c] sm:$0xf]  ;;  %v3482_v16 = vld [vmem:[#allocation10 + $0x558] sm:$0xf0]  ;;  %v3357_v23 = vor.u32 %v3799_v12, %v3354_v9 }
 0x113   :  { %2282 = vmatpush.bf16.msrb.mxu1 %v3465_v49  ;;  %v3839_v49 = vld [vmem:[#allocation10 + $0x58c] sm:$0xf]  ;;  %v3338_v31 = vld [vmem:[#allocation10 + $0x438] sm:$0xf0] }
 0x114   :  { %2295 = vmatpush.bf16.msrb.mxu2 %v2829_v50  ;;  %2308 = vmatpush.bf16.msrb.mxu3 %v2957_v54  ;;  %v3133_v50 = vor.u32 %v3743_v35, %v3130_v41  ;;  %v3771_v54 = vld [vmem:[#allocation10 + $0x36c] sm:$0xf]  ;;  %v3466_v34 = vld [vmem:[#allocation10 + $0x538] sm:$0xf0] }
 0x115   :  { %v3763_v17 = vld [vmem:[#allocation10 + $0x32c] sm:$0xf]  ;;  %v3066_v41 = vld [vmem:[#allocation10 + $0x218] sm:$0xf0] }
 0x116   :  { %2270 = vmatpush.bf16.msrb.mxu0 %v3321_v60  ;;  %v2064_v51 = vpop.f32.mrf.mxu0  ;;  %v3835_v60 = vld [vmem:[#allocation10 + $0x56c] sm:$0xf]  ;;  %v3194_v46 = vld [vmem:[#allocation10 + $0x318] sm:$0xf0] }
 0x117   :  { %2283 = vmatpush.bf16.msrb.mxu1 %v3449_v1  ;;  %v2065_v57 = vadd.f32 %v2064_v51, %v1087_v63  ;;  %v2077_v7 = vpop.f32.mrf.mxu1  ;;  %v3245_v1 = vor.u32 %v3771_v54, %v3242_v32  ;;  %v3795_v30 = vld [vmem:[#allocation10 + $0x42c] sm:$0xf]  ;;  %v3322_v48 = vld [vmem:[#allocation10 + $0x418] sm:$0xf0] }
 0x118   :  { %2296 = vmatpush.bf16.msrb.mxu2 %v2813_v3  ;;  %2309 = vmatpush.bf16.msrb.mxu3 %v2941_v6  ;;  %v3373_v3 = vor.u32 %v3803_v59, %v3370_v2  ;;  %v3767_v6 = vld [vmem:[#allocation10 + $0x34c] sm:$0xf] }
 0x119   :  { %2271 = vmatmul.bf16.vlgmr.msrb.gmra.mxu0 %v4135_v15  ;;  %v2078_v62 = vadd.f32 %v2077_v7, %v2065_v57  ;;  %v3827_v33 = vld [vmem:[#allocation10 + $0x52c] sm:$0xf] }
 0x11a   :  { %2315 = vmatpush.bf16.msra.mxu0 %v3181_v8  ;;  %2284 = vmatmul.bf16.vlgmr.msrb.gmra.mxu1 %v4137_v20  ;;  %v3759_v43 = vld [vmem:[#allocation10 + $0x30c] sm:$0xf] }
 0x11b   :  { %2328 = vmatpush.bf16.msra.mxu1 %v3309_v10  ;;  %2297 = vmatmul.bf16.vlgmr.msrb.gmra.mxu2 %v4125_v39  ;;  %v3277_v39 = vor.u32 %v3779_v27, %v3274_v28  ;;  %v3501_v10 = vor.u32 %v3835_v60, %v3498_v61  ;;  %v3485_v28 = vor.u32 %v3831_v14, %v3482_v16  ;;  %v3791_v47 = vld [vmem:[#allocation10 + $0x40c] sm:$0xf] }
 0x11c   :  { %2341 = vmatpush.bf16.msra.mxu2 %v3437_v11  ;;  %2354 = vmatpush.bf16.msra.mxu3 %v3565_v37  ;;  %v3226_v11 = vld [vmem:[#allocation10 + $0x358] sm:$0xf0] }
 0x11d   :  { %2310 = vmatmul.bf16.vlgmr.msrb.gmra.mxu3 %v4129_v42  ;;  %v3514_v42 = vld [vmem:[#allocation10 + $0x598] sm:$0xf0] }
 0x11e   :  { %2316 = vmatpush.bf16.msra.mxu0 %v3165_v22  ;;  %v3517_v58 = vor.u32 %v3839_v49, %v3514_v42  ;;  %v2090_v8 = vpop.f32.mrf.mxu2  ;;  %v2066_v19 = vpop.f32.mrf.mxu0  ;;  %v3229_v22 = vor.u32 %v3767_v6, %v3226_v11  ;;  %v3823_v42 = vld [vmem:[#allocation10 + $0x50c] sm:$0xf] }
 0x11f   :  { %2329 = vmatpush.bf16.msra.mxu1 %v3293_v24  ;;  %v2091_v13 = vadd.f32 %v2090_v8, %v2078_v62  ;;  %v3731_v24 = vld [vmem:[#allocation10 + $0x22c] sm:$0xf]  ;;  %v2079_v27 = vpop.f32.mrf.mxu1 }
 0x120   :  { %2342 = vmatpush.bf16.msra.mxu2 %v3421_v26  ;;  %2355 = vmatpush.bf16.msra.mxu3 %v3549_v29  ;;  %v2103_v37 = vpop.f32.mrf.mxu3  ;;  %v3082_v26 = vld [vmem:[#allocation10 + $0x238] sm:$0xf0] }
 0x121   :  { %v2104_v21 = vadd.f32 %v2103_v37, %v2091_v13  ;;  %v3210_v29 = vld [vmem:[#allocation10 + $0x338] sm:$0xf0] }
 0x122   :  { %2317 = vmatpush.bf16.msra.mxu0 %v3149_v44  ;;  %v3085_v44 = vor.u32 %v3731_v24, %v3082_v26  ;;  %v3213_v35 = vor.u32 %v3763_v17, %v3210_v29 }
 0x123   :  { %2330 = vmatpush.bf16.msra.mxu1 %v3277_v39  ;;  %v3341_v39 = vor.u32 %v3795_v30, %v3338_v31  ;;  %v1089_v30 = vperm.slane %v4188_v36, 2 }
 0x124   :  { %2343 = vmatpush.bf16.msra.mxu2 %v3405_v38  ;;  %2356 = vmatpush.bf16.msra.mxu3 %v3533_v45  ;;  %v3727_v38 = vld [vmem:[#allocation10 + $0x20c] sm:$0xf]  ;;  %v3469_v45 = vor.u32 %v3827_v33, %v3466_v34 }
 0x125   :  { %v3069_v51 = vor.u32 %v3727_v38, %v3066_v41 }
 0x126   :  { %2318 = vmatpush.bf16.msra.mxu0 %v3133_v50  ;;  %v2092_v63 = vpop.f32.mrf.mxu2  ;;  %v3450_v50 = vld [vmem:[#allocation10 + $0x518] sm:$0xf0] }
 0x127   :  { %2331 = vmatpush.bf16.msra.mxu1 %v3261_v52  ;;  %v3197_v52 = vor.u32 %v3759_v43, %v3194_v46  ;;  %v3453_v55 = vor.u32 %v3823_v42, %v3450_v50 }
 0x128   :  { %2344 = vmatpush.bf16.msra.mxu2 %v3389_v53  ;;  %2357 = vmatpush.bf16.msra.mxu3 %v3517_v58  ;;  %v2105_v49 = vpop.f32.mrf.mxu3  ;;  %v3325_v53 = vor.u32 %v3791_v47, %v3322_v48  ;;  %v1088_v58 = vperm.slane %v4188_v36, 1 }
 0x12a   :  { %2319 = vmatpush.bf16.msra.mxu0 %v3117_v0 }
 0x12b   :  { %2332 = vmatpush.bf16.msra.mxu1 %v3245_v1 }
 0x12c   :  { %2345 = vmatpush.bf16.msra.mxu2 %v3373_v3  ;;  %2358 = vmatpush.bf16.msra.mxu3 %v3501_v10 }
 0x12e   :  { %2320 = vmatpush.bf16.msra.mxu0 %v3101_v18 }
 0x12f   :  { %2333 = vmatpush.bf16.msra.mxu1 %v3229_v22 }
 0x130   :  { %2346 = vmatpush.bf16.msra.mxu2 %v3357_v23  ;;  %2359 = vmatpush.bf16.msra.mxu3 %v3485_v28 }
 0x132   :  { %2321 = vmatpush.bf16.msra.mxu0 %v3085_v44 }
 0x133   :  { %2334 = vmatpush.bf16.msra.mxu1 %v3213_v35  ;;  %v1090_v35 = vperm.slane %v4188_v36, 3 }
 0x134   :  { %2347 = vmatpush.bf16.msra.mxu2 %v3341_v39  ;;  %2360 = vmatpush.bf16.msra.mxu3 %v3469_v45 }
 0x136   :  { %2322 = vmatpush.bf16.msra.mxu0 %v3069_v51  ;;  %v2116_v56 = vpop.f32.mrf.mxu0 }
 0x137   :  { %2335 = vmatpush.bf16.msra.mxu1 %v3197_v52  ;;  %v2117_v54 = vadd.f32 %v2116_v56, %v2104_v21  ;;  %v2129_v57 = vpop.f32.mrf.mxu1 }
 0x138   :  { %2348 = vmatpush.bf16.msra.mxu2 %v3325_v53  ;;  %2361 = vmatpush.bf16.msra.mxu3 %v3453_v55 }
 0x139   :  { %2323 = vmatmul.bf16.vlgmr.msra.gmra.mxu0 %v4123_v25  ;;  %v2130_v7 = vadd.f32 %v2129_v57, %v2117_v54 }
 0x13a   :  { %2336 = vmatmul.bf16.vlgmr.msra.gmra.mxu1 %v4127_v40 }
 0x13b   :  { %2349 = vmatmul.bf16.vlgmr.msra.gmra.mxu2 %v4135_v15  ;;  %2362 = vmatmul.bf16.vlgmr.msra.gmra.mxu3 %v4137_v20 }
 0x13e   :  { %v2142_v32 = vpop.f32.mrf.mxu2  ;;  %v2118_v40 = vpop.f32.mrf.mxu0 }
 0x13f   :  { %v2143_v25 = vadd.f32 %v2142_v32, %v1088_v58  ;;  %v2131_v15 = vpop.f32.mrf.mxu1 }
 0x140   :  { %v2155_v59 = vpop.f32.mrf.mxu3 }
 0x141   :  { %v2156_v20 = vadd.f32 %v2155_v59, %v2143_v25 }
 0x146   :  { %v2144_v2 = vpop.f32.mrf.mxu2 }
 0x148   :  { %v2157_v60 = vpop.f32.mrf.mxu3 }
 0x156   :  { %v2168_v61 = vpop.f32.mrf.mxu0 }
 0x157   :  { %v2169_v62 = vadd.f32 %v2168_v61, %v2156_v20  ;;  %v2181_v0 = vpop.f32.mrf.mxu1 }
 0x159   :  { %v2182_v1 = vadd.f32 %v2181_v0, %v2169_v62 }
 0x15e   :  { %v2194_v3 = vpop.f32.mrf.mxu2  ;;  %v2170_v8 = vpop.f32.mrf.mxu0 }
 0x15f   :  { %v2195_v4 = vadd.f32 %v2194_v3, %v2182_v1  ;;  %v2183_v10 = vpop.f32.mrf.mxu1 }
 0x160   :  { %v2207_v5 = vpop.f32.mrf.mxu3 }
 0x161   :  { %v2208_v6 = vadd.f32 %v2207_v5, %v2195_v4 }
 0x163   :  { %v2371_v11 = vrot.slane %v2208_v6, 6 }
 0x165   :  { %v2374_v12 = vsel %vm860_vm0, %v2130_v7, %v2371_v11 }
 0x166   :  { %v2196_v9 = vpop.f32.mrf.mxu2 }
 0x168   :  { %v2209_v13 = vpop.f32.mrf.mxu3 }
 0x176   :  { %v2220_v37 = vpop.f32.mrf.mxu0 }
 0x177   :  { %v2233_v14 = vpop.f32.mrf.mxu1  ;;  %v2221_v34 = vadd.f32 %v2220_v37, %v1089_v30 }
 0x179   :  { %v2234_v44 = vadd.f32 %v2233_v14, %v2221_v34 }
 0x17e   :  { %v2246_v16 = vpop.f32.mrf.mxu2  ;;  %v2222_v21 = vpop.f32.mrf.mxu0 }
 0x17f   :  { %v2235_v19 = vpop.f32.mrf.mxu1  ;;  %v2247_v39 = vadd.f32 %v2246_v16, %v2234_v44 }
 0x180   :  { %v2259_v18 = vpop.f32.mrf.mxu3 }
 0x181   :  { %v2260_v41 = vadd.f32 %v2259_v18, %v2247_v39 }
 0x186   :  { %v2248_v22 = vpop.f32.mrf.mxu2 }
 0x188   :  { %v2261_v23 = vpop.f32.mrf.mxu3 }
 0x196   :  { %v2272_v24 = vpop.f32.mrf.mxu0 }
 0x197   :  { %v2285_v26 = vpop.f32.mrf.mxu1  ;;  %v2273_v47 = vadd.f32 %v2272_v24, %v2260_v41 }
 0x199   :  { %v2286_v42 = vadd.f32 %v2285_v26, %v2273_v47 }
 0x19b   :  { %v2372_v36 = vrot.slane %v2286_v42, 4 }
 0x19e   :  { %v2298_v17 = vpop.f32.mrf.mxu2  ;;  %v2274_v28 = vpop.f32.mrf.mxu0 }
 0x19f   :  { %v2287_v29 = vpop.f32.mrf.mxu1  ;;  %v2299_v38 = vadd.f32 %v2298_v17, %v1090_v35 }
 0x1a0   :  { %v2311_v27 = vpop.f32.mrf.mxu3 }
 0x1a1   :  { %v2312_v43 = vadd.f32 %v2311_v27, %v2299_v38 }
 0x1a6   :  { %v2300_v31 = vpop.f32.mrf.mxu2 }
 0x1a8   :  { %v2313_v33 = vpop.f32.mrf.mxu3 }
 0x1b6   :  { %v2324_v63 = vpop.f32.mrf.mxu0 }
 0x1b7   :  { %v2337_v45 = vpop.f32.mrf.mxu1  ;;  %v2325_v46 = vadd.f32 %v2324_v63, %v2312_v43 }
 0x1b9   :  { %v2338_v48 = vadd.f32 %v2337_v45, %v2325_v46 }
 0x1be   :  { %v2350_v49 = vpop.f32.mrf.mxu2  ;;  %v2363_v51 = vpop.f32.mrf.mxu3 }
 0x1bf   :  { %v2351_v50 = vadd.f32 %v2350_v49, %v2338_v48  ;;  %v2326_v52 = vpop.f32.mrf.mxu0  ;;  %v2339_v53 = vpop.f32.mrf.mxu1 }
 0x1c1   :  { %v2364_v55 = vadd.f32 %v2363_v51, %v2351_v50 }
 0x1c3   :  { %v2373_v56 = vrot.slane %v2364_v55, 2 }
 0x1c5   :  { %v2375_v54 = vsel %vm862_vm1, %v2372_v36, %v2373_v56 }
 0x1c6   :  { %v2352_v57 = vpop.f32.mrf.mxu2  ;;  %v2376_v7 = vsel %vm864_vm2, %v2374_v12, %v2375_v54  ;;  %v2365_v58 = vpop.f32.mrf.mxu3 }
 0x1c7   :  { %2378 = vst [vmem:[#allocation12] sm:$0xff] %v2376_v7 }
 0x1c8   :  { %2400 = dma.vmem_to_hbm [thread:$0]  %s2396_s29, 128, %s2398_s9, [#allocation13]  }
 0x1c9   :  { %4037 = dma.done.wait [#allocation4], 128  }
 0x1ca   :  { %4038 = vsyncadd [#allocation4], 4294967168 }
 0x1cb   :  { %4039 = dma.done.wait [#allocation13], 128  }
 0x1cc   :  { %4040 = vsyncadd [#allocation13], 4294967168 }
 0x1cd   :  { %2409 = vsyncpa [#allocation3], 1 }
 0x1ce   :  { %2410 = vsyncpa [#allocation6], 1 }
 0x1cf   :  { %2411 = vsyncpa [#allocation9], 1 }
 0x1d0   :  { %2412 = vsyncpa [#allocation4], 1 }
 0x1d1   :  { %2413 = vsyncpa [#allocation13], 1 }

</bundles_post_ra>
